<compile_context>
chip_gen: v6e
topology: v6e:2x2x1
jax: 0.10.0
libtpu: 0.0.40
codegen_flags: <defaults>
</compile_context>

<pallas_src>
import functools

import jax
import jax.numpy as jnp
from jax import lax
from jax.experimental import pallas as pl
from jax.experimental.pallas import tpu as pltpu


def _wavenet_kernel(x_ref, cond_ref,
                    w_in_ref, b_in_ref,
                    w_blk_ref, w_cond_ref, b_cond_ref,
                    w_out_ref, br_ref, bs_ref,
                    wh1_ref, bh1_ref, wh2_ref, bh2_ref,
                    out_ref,
                    tail_ref,
                    *, dilations, d_max, tt, R, S):
    f32 = jnp.float32
    bf16 = jnp.bfloat16
    t_idx = pl.program_id(1)

    # New batch element -> reset the causal carry (== zero left padding of the dilated taps).
    @pl.when(t_idx == 0)
    def _():
        tail_ref[...] = jnp.zeros(tail_ref.shape, tail_ref.dtype)

    x = x_ref[0].astype(f32)     # [1, tt]   bf16 in HBM; VPU math in f32 (v5e-safe)
    cond = cond_ref[0]           # [M, tt]   bf16, only feeds the MXU

    # input 1x1 conv: rank-1 broadcast product on the VPU, channel-major [R, tt].
    res = w_in_ref[...] * x + b_in_ref[...]                         # [R, tt] f32

    skip_sum = jnp.zeros((S, tt), f32)

    # TODO(synk): at production depth (NB=16, R=120) stream per-block weights via a grid
    # axis / fori_loop with res+skip_sum in VMEM scratch if vreg spills appear; the toy
    # NB here is small enough to fully unroll.
    for blk, d in enumerate(dilations):            # static unroll
        # Causal dilated tap prev[:, t] = res_global[:, t - d]: a lane concat of the carry
        # tail (last d_max columns of the previous tile's residual stream) with res.
        tail = tail_ref[blk]                                         # [R, d_max] f32
        prev = jnp.concatenate([tail[:, d_max - d:], res[:, :tt - d]], axis=1)   # [R, tt]
        tail_ref[blk] = res[:, tt - d_max:]        # carry to next tile (needs tt >= d_max)

        # Per-block conditioning projection (small, short-lived -> v7x VMEM friendly).
        cond_fg = (jnp.dot(w_cond_ref[blk], cond, preferred_element_type=f32)
                   + b_cond_ref[blk])                                # [2R, tt] f32

        # Fused dilated conv (both taps, filter+gate halves) in a single matmul.
        pr = jnp.concatenate([prev, res], axis=0).astype(bf16)       # [2R, tt]
        fg = jnp.dot(w_blk_ref[blk], pr, preferred_element_type=f32) + cond_fg
        # Gate math kept f32 (v5e has no bf16 VPU/EUP); bf16 here is an optional v6e/v7x win.
        gated = jnp.tanh(fg[:R]) * jax.nn.sigmoid(fg[R:])            # [R, tt] f32

        # Fused skip + residual 1x1 convs in one matmul: rows [0:S]=skip, [S:]=residual.
        so = jnp.dot(w_out_ref[blk], gated.astype(bf16),
                     preferred_element_type=f32)                     # [S+R, tt] f32
        skip_sum = skip_sum + so[:S]
        res = res + so[S:] + br_ref[blk]

    # head: ReLU -> 1x1 conv -> ReLU -> 1x1 conv, all channel-major.
    h = jnp.maximum(skip_sum + bs_ref[...], 0.0)
    h = jnp.dot(wh1_ref[...], h.astype(bf16), preferred_element_type=f32) + bh1_ref[...]
    h = jnp.maximum(h, 0.0)
    logits = jnp.dot(wh2_ref[...], h.astype(bf16), preferred_element_type=f32) + bh2_ref[...]

    # logits are already [Q, tt] with time lane-dense == PyTorch NCT; no transpose needed.
    out_ref[0] = logits


def init_params(key, cfg):
    M = cfg["num_mels"]; R = cfg["residual_channels"]; S = cfg["skip_channels"]
    Q = cfg["num_quants"]; K = cfg["upsample_kernel"]; NB = cfg["num_blocks"]
    keys = jax.random.split(key, 12)

    def xavier(k, shape, fan_in, fan_out):
        lim = (6.0 / (fan_in + fan_out)) ** 0.5
        return jax.random.uniform(k, shape, jnp.float32, -lim, lim)

    p = {}
    # upsample ConvTranspose1d weight in PyTorch layout (in, out, kernel)
    p["w_up"] = xavier(keys[0], (M, M, K), M * K, M * K)
    p["b_up"] = jnp.zeros((M,), jnp.float32)
    # input 1x1 conv (PyTorch (R,1,1)) stored as [1, R]
    p["w_in"] = xavier(keys[1], (1, R), 1, R)
    p["b_in"] = jnp.zeros((1, R), jnp.float32)
    # per-block weights, stacked over blocks; [in, out] layout
    p["wfp"] = xavier(keys[2], (NB, R, R), 2 * R, R)   # dilated conv, tap t-d, filter half
    p["wfc"] = xavier(keys[3], (NB, R, R), 2 * R, R)   # dilated conv, tap t,   filter half
    p["bf"] = jnp.zeros((NB, 1, R), jnp.float32)
    p["wgp"] = xavier(keys[4], (NB, R, R), 2 * R, R)   # gate half
    p["wgc"] = xavier(keys[5], (NB, R, R), 2 * R, R)
    p["bg"] = jnp.zeros((NB, 1, R), jnp.float32)
    p["wcf"] = xavier(keys[6], (NB, M, R), M, R)       # conditioning 1x1, filter half
    p["bcf"] = jnp.zeros((NB, 1, R), jnp.float32)
    p["wcg"] = xavier(keys[7], (NB, M, R), M, R)       # conditioning 1x1, gate half
    p["bcg"] = jnp.zeros((NB, 1, R), jnp.float32)
    p["ws"] = xavier(keys[8], (NB, R, S), R, S)        # skip 1x1
    p["bs"] = jnp.zeros((NB, 1, S), jnp.float32)
    p["wr"] = xavier(keys[9], (NB, R, R), R, R)        # residual 1x1
    p["br"] = jnp.zeros((NB, 1, R), jnp.float32)
    # head 1x1 convs
    p["wh1"] = xavier(keys[10], (S, Q), S, Q)
    p["bh1"] = jnp.zeros((1, Q), jnp.float32)
    p["wh2"] = xavier(keys[11], (Q, Q), Q, Q)
    p["bh2"] = jnp.zeros((1, Q), jnp.float32)
    return p


def _upsample(params, melspecs, cfg):
    # TODO(synk): the ConvTranspose1d upsampler stays in plain-JAX glue
    # (lax.conv_general_dilated with lhs_dilation); the WaveNet stack + head are the hot
    # path and run inside the fused Pallas kernel.
    K = cfg["upsample_kernel"]; p_ = cfg["pad"]; stride = cfg["hop_length"]
    rhs = jnp.flip(jnp.transpose(params["w_up"], (1, 0, 2)), axis=-1)   # (O, I, K)
    conditions = lax.conv_general_dilated(
        melspecs, rhs,
        window_strides=(1,),
        padding=[(K - 1 - p_, K - 1 - p_)],
        lhs_dilation=(stride,),
        dimension_numbers=("NCH", "OIH", "NCH"))
    return conditions + params["b_up"][None, :, None]


def _vmem_limit_bytes():
    # Generation-aware VMEM budget: 40 MiB is plenty on 128 MiB parts (v5e/v6e); on v7x
    # (64 MiB physical) stay at <= half so double-buffered IO + resident weights still fit.
    try:
        cap = pltpu.get_tpu_info().vmem_capacity_bytes
    except Exception:
        cap = 128 * 1024 * 1024
    return int(min(40 * 1024 * 1024, cap // 2))


def wavenet_forward(params, waveforms, melspecs, cfg, *, t_tile=512):
    conditions = _upsample(params, melspecs, cfg)            # [B, M, Tc], native NCT

    B = waveforms.shape[0]
    T = min(waveforms.shape[-1], conditions.shape[-1])
    M = cfg["num_mels"]; R = cfg["residual_channels"]; S = cfg["skip_channels"]
    Q = cfg["num_quants"]
    dilations = tuple(cfg["dilations"])
    NB = len(dilations)
    d_max = max(dilations)

    # ---- T tiling (time is the lane axis everywhere) --------------------------------
    if T <= t_tile:
        tt, nt, t_pad = T, 1, T
    else:
        tt = max(128, (t_tile // 128) * 128)   # lane-dense [*, tt] blocks need tt % 128 == 0
        nt = -(-T // tt)
        t_pad = nt * tt
    # Simplified causal carry (tail = last d_max time columns of res) needs tt >= d_max.
    assert tt >= d_max, f"t_tile ({tt}) must be >= max dilation ({d_max})"

    bf16 = jnp.bfloat16
    # Streamed inputs in bf16 (they only feed the MXU / one broadcast multiply): halves
    # per-tile HBM traffic; time stays on the lane axis (contiguous lane-dense DMA).
    x = waveforms[:, None, :T].astype(bf16)                  # [B, 1, T]
    cond = conditions[:, :, :T].astype(bf16)                 # [B, M, T]   (no transpose)
    if t_pad > T:
        x = jnp.pad(x, ((0, 0), (0, 0), (0, t_pad - T)))
        cond = jnp.pad(cond, ((0, 0), (0, 0), (0, t_pad - T)))

    # ---- fold / transpose / stack weights to channel-major (one-time prep) ----------
    tr = lambda a: jnp.transpose(a, (0, 2, 1))
    # fused dilated-conv weight [NB, 2R(out: filter|gate), 2R(in: prev|res)]
    w_blk = jnp.concatenate(
        [jnp.concatenate([tr(params["wfp"]), tr(params["wfc"])], axis=2),
         jnp.concatenate([tr(params["wgp"]), tr(params["wgc"])], axis=2)],
        axis=1).astype(bf16)
    # conditioning 1x1 weight [NB, 2R, M] and pre-summed bias [NB, 2R, 1]
    w_cond = jnp.concatenate([tr(params["wcf"]), tr(params["wcg"])], axis=1).astype(bf16)
    b_cond = jnp.concatenate([tr(params["bf"] + params["bcf"]),
                              tr(params["bg"] + params["bcg"])], axis=1)
    # fused skip + residual weight [NB, S+R, R]; biases [NB, R, 1] / [S, 1]
    w_out = jnp.concatenate([tr(params["ws"]), tr(params["wr"])], axis=1).astype(bf16)
    br = tr(params["br"])
    bs_total = jnp.sum(params["bs"], axis=0).T               # [S, 1]

    weights = [params["w_in"].T, params["b_in"].T,           # [R, 1]
               w_blk, w_cond, b_cond,
               w_out, br, bs_total,
               params["wh1"].T.astype(bf16), params["bh1"].T,
               params["wh2"].T.astype(bf16), params["bh2"].T]

    # Constant-index weight specs: Pallas DMAs them once (block index never changes).
    # TODO(synk): single-buffer the resident weights (pl.Buffered(1) pipeline_mode or a
    # one-shot DMA into scratch) — only material inside v7x's 64 MiB VMEM at NB=16/R=120.
    def full_spec(arr):
        n = arr.ndim
        return pl.BlockSpec(arr.shape, lambda b, t, n=n: (0,) * n)

    kernel = functools.partial(_wavenet_kernel, dilations=dilations,
                               d_max=d_max, tt=tt, R=R, S=S)

    # NOTE: the causal carry requires the T-tile axis to stay "arbitrary" (per-batch tiles
    # run in order on one core); only the batch axis may be "parallel" (megacore).
    # TODO(synk): for B=1 inference on v7x, split T into two per-core halves with a
    # receptive-field warm-up overlap so both TensorCores are used.
    logits = pl.pallas_call(
        kernel,
        out_shape=jax.ShapeDtypeStruct((B, Q, t_pad), jnp.float32),
        grid_spec=pltpu.PrefetchScalarGridSpec(
            num_scalar_prefetch=0,
            grid=(B, nt),
            in_specs=[pl.BlockSpec((1, 1, tt), lambda b, t: (b, 0, t)),
                      pl.BlockSpec((1, M, tt), lambda b, t: (b, 0, t))]
                     + [full_spec(w) for w in weights],
            out_specs=pl.BlockSpec((1, Q, tt), lambda b, t: (b, 0, t)),
            scratch_shapes=[pltpu.VMEM((NB, R, d_max), jnp.float32)],   # causal carry
        ),
        compiler_params=pltpu.CompilerParams(
            dimension_semantics=("parallel", "arbitrary"),
            vmem_limit_bytes=_vmem_limit_bytes()),
    )(x, cond, *weights)

    return logits[:, :, :T]          # already PyTorch NCT [B, num_quants, T]


def wavenet_reference(params, waveforms, melspecs, cfg):
    """Pure-JAX f32 reference (time on last axis, NCT), mirrors the PyTorch module."""
    hi = jax.lax.Precision.HIGHEST
    conditions = _upsample(params, melspecs, cfg)
    T = min(waveforms.shape[-1], conditions.shape[-1])
    x = waveforms[:, :T].astype(jnp.float32)                 # [B, T]
    cond = conditions[:, :, :T]                              # [B, M, T]
    res = (params["w_in"][0][None, :, None] * x[:, None, :]
           + params["b_in"][0][None, :, None])               # [B, R, T]
    skip_sum = 0.0
    for blk, d in enumerate(cfg["dilations"]):
        prev = jnp.pad(res, ((0, 0), (0, 0), (d, 0)))[:, :, :T]
        f = (jnp.einsum('bit,io->bot', prev, params["wfp"][blk], precision=hi)
             + jnp.einsum('bit,io->bot', res, params["wfc"][blk], precision=hi)
             + jnp.einsum('bmt,mo->bot', cond, params["wcf"][blk], precision=hi)
             + (params["bf"][blk] + params["bcf"][blk]).T[None])
        g = (jnp.einsum('bit,io->bot', prev, params["wgp"][blk], precision=hi)
             + jnp.einsum('bit,io->bot', res, params["wgc"][blk], precision=hi)
             + jnp.einsum('bmt,mo->bot', cond, params["wcg"][blk], precision=hi)
             + (params["bg"][blk] + params["bcg"][blk]).T[None])
        gated = jnp.tanh(f) * jax.nn.sigmoid(g)
        skip_sum = skip_sum + (jnp.einsum('bit,io->bot', gated, params["ws"][blk],
                                          precision=hi) + params["bs"][blk].T[None])
        res = res + (jnp.einsum('bit,io->bot', gated, params["wr"][blk],
                                precision=hi) + params["br"][blk].T[None])
    h = jnp.maximum(skip_sum, 0.0)
    h = jnp.einsum('bit,io->bot', h, params["wh1"], precision=hi) + params["bh1"].T[None]
    h = jnp.maximum(h, 0.0)
    return jnp.einsum('bit,io->bot', h, params["wh2"], precision=hi) + params["bh2"].T[None]


if __name__ == "__main__":
    # small config consistent with the module's constructor constraints
    cfg = dict(num_mels=8, num_quants=16, win_length=32, hop_length=8,
               upsample_kernel=24, residual_channels=16, skip_channels=32,
               causal_kernel=2, num_blocks=4, dilation_cycle=2)
    assert cfg["num_blocks"] % cfg["dilation_cycle"] == 0
    cfg["pad"] = (cfg["upsample_kernel"] + 4 * cfg["hop_length"] - cfg["win_length"]) // 2
    num_cycles = cfg["num_blocks"] // cfg["dilation_cycle"]
    cfg["dilations"] = tuple([2 ** pw for pw in range(cfg["dilation_cycle"])] * num_cycles)

    key = jax.random.PRNGKey(0)
    pkey, wkey, mkey = jax.random.split(key, 3)
    params = init_params(pkey, cfg)

    B, L_mel, L_wav = 2, 32, 256
    waveforms = jax.random.uniform(wkey, (B, L_wav), jnp.float32, minval=-1.0, maxval=1.0)
    melspecs = jax.random.normal(mkey, (B, cfg["num_mels"], L_mel), jnp.float32)

    # t_tile=128 deliberately exercises the multi-tile path (2 T-tiles, causal carry,
    # tail padding); the default 512 is for real audio lengths.
    logits = wavenet_forward(params, waveforms, melspecs, cfg, t_tile=128)
    logits = jax.block_until_ready(logits)

    cond_len = (L_mel - 1) * cfg["hop_length"] + cfg["upsample_kernel"] - 2 * cfg["pad"]
    expected_T = min(L_wav, cond_len)
    assert logits.shape == (B, cfg["num_quants"], expected_T), logits.shape
    assert bool(jnp.all(jnp.isfinite(logits)))

    # Pure-JAX f32 reference check; tolerance covers the kernel's bf16 matmul operands.
    ref = wavenet_reference(params, waveforms, melspecs, cfg)
    err = float(jnp.max(jnp.abs(logits - ref)))
    assert err < 0.15, f"max |kernel - reference| too large: {err}"

    print("KERNEL_OK")
</pallas_src>

<mosaic_0001>
module attributes {stable_mosaic.version = 11 : i64} {
  func.func @_wavenet_kernel(%arg0: i32, %arg1: i32, %arg2: memref<1x1x128xbf16, #tpu.memory_space<vmem>>, %arg3: memref<1x8x128xbf16, #tpu.memory_space<vmem>>, %arg4: memref<16x1xf32, #tpu.memory_space<vmem>>, %arg5: memref<16x1xf32, #tpu.memory_space<vmem>>, %arg6: memref<4x32x32xbf16, #tpu.memory_space<vmem>>, %arg7: memref<4x32x8xbf16, #tpu.memory_space<vmem>>, %arg8: memref<4x32x1xf32, #tpu.memory_space<vmem>>, %arg9: memref<4x48x16xbf16, #tpu.memory_space<vmem>>, %arg10: memref<4x16x1xf32, #tpu.memory_space<vmem>>, %arg11: memref<32x1xf32, #tpu.memory_space<vmem>>, %arg12: memref<16x32xbf16, #tpu.memory_space<vmem>>, %arg13: memref<16x1xf32, #tpu.memory_space<vmem>>, %arg14: memref<16x16xbf16, #tpu.memory_space<vmem>>, %arg15: memref<16x1xf32, #tpu.memory_space<vmem>>, %arg16: memref<1x16x128xf32, #tpu.memory_space<vmem>>, %arg17: memref<4x16x2xf32, #tpu.memory_space<vmem>>) attributes {dimension_semantics = [#tpu.dimension_semantics<parallel>, #tpu.dimension_semantics<arbitrary>], iteration_bounds = array<i64: 2, 2>, scalar_prefetch = 0 : i64, scratch_operands = 1 : i64, tpu.core_type = #tpu.core_type<tc>, window_params = [{transform_indices = @transform_0, window_bounds = array<i64: 1, 1, 128>}, {transform_indices = @transform_1, window_bounds = array<i64: 1, 8, 128>}, {pipeline_mode = #tpu.pipeline_mode<synchronous>, transform_indices = @transform_2, window_bounds = array<i64: 16, 1>}, {pipeline_mode = #tpu.pipeline_mode<synchronous>, transform_indices = @transform_3, window_bounds = array<i64: 16, 1>}, {pipeline_mode = #tpu.pipeline_mode<synchronous>, transform_indices = @transform_4, window_bounds = array<i64: 4, 32, 32>}, {pipeline_mode = #tpu.pipeline_mode<synchronous>, transform_indices = @transform_5, window_bounds = array<i64: 4, 32, 8>}, {pipeline_mode = #tpu.pipeline_mode<synchronous>, transform_indices = @transform_6, window_bounds = array<i64: 4, 32, 1>}, {pipeline_mode = #tpu.pipeline_mode<synchronous>, transform_indices = @transform_7, window_bounds = array<i64: 4, 48, 16>}, {pipeline_mode = #tpu.pipeline_mode<synchronous>, transform_indices = @transform_8, window_bounds = array<i64: 4, 16, 1>}, {pipeline_mode = #tpu.pipeline_mode<synchronous>, transform_indices = @transform_9, window_bounds = array<i64: 32, 1>}, {pipeline_mode = #tpu.pipeline_mode<synchronous>, transform_indices = @transform_10, window_bounds = array<i64: 16, 32>}, {pipeline_mode = #tpu.pipeline_mode<synchronous>, transform_indices = @transform_11, window_bounds = array<i64: 16, 1>}, {pipeline_mode = #tpu.pipeline_mode<synchronous>, transform_indices = @transform_12, window_bounds = array<i64: 16, 16>}, {pipeline_mode = #tpu.pipeline_mode<synchronous>, transform_indices = @transform_13, window_bounds = array<i64: 16, 1>}, {transform_indices = @transform_14, window_bounds = array<i64: 1, 16, 128>}]} {
    %c0_i32 = arith.constant 0 : i32
    %0 = arith.cmpi eq, %arg1, %c0_i32 : i32
    %1 = arith.extui %0 : i1 to i32
    %c0_i32_0 = arith.constant 0 : i32
    %2 = arith.cmpi ne, %1, %c0_i32_0 : i32
    scf.if %2 {
      %cst_121 = arith.constant 0.000000e+00 : f32
      %202 = vector.broadcast %cst_121 : f32 to vector<4x16x2xf32>
      %c0_122 = arith.constant 0 : index
      %c0_123 = arith.constant 0 : index
      %c0_124 = arith.constant 0 : index
      %203 = vector.load %arg17[%c0_122, %c0_123, %c0_124] : memref<4x16x2xf32, #tpu.memory_space<vmem>>, vector<4x16x2xf32>
      tpu.vector_store %arg17[%c0_122, %c0_123, %c0_124], %202 {strides = array<i32>} : memref<4x16x2xf32, #tpu.memory_space<vmem>>, vector<4x16x2xf32>,
    } else {
    }
    %c0 = arith.constant 0 : index
    %c0_1 = arith.constant 0 : index
    %c0_2 = arith.constant 0 : index
    %3 = vector.load %arg2[%c0, %c0_1, %c0_2] : memref<1x1x128xbf16, #tpu.memory_space<vmem>>, vector<1x1x128xbf16>
    %4 = vector.shape_cast %3 : vector<1x1x128xbf16> to vector<1x128xbf16>
    %5 = arith.extf %4 : vector<1x128xbf16> to vector<1x128xf32>
    %c0_3 = arith.constant 0 : index
    %c0_4 = arith.constant 0 : index
    %c0_5 = arith.constant 0 : index
    %6 = vector.load %arg3[%c0_3, %c0_4, %c0_5] : memref<1x8x128xbf16, #tpu.memory_space<vmem>>, vector<1x8x128xbf16>
    %7 = vector.shape_cast %6 : vector<1x8x128xbf16> to vector<8x128xbf16>
    %c0_6 = arith.constant 0 : index
    %c0_7 = arith.constant 0 : index
    %8 = vector.load %arg4[%c0_6, %c0_7] : memref<16x1xf32, #tpu.memory_space<vmem>>, vector<16x1xf32>
    %9 = vector.broadcast %8 : vector<16x1xf32> to vector<16x128xf32>
    %10 = vector.broadcast %5 : vector<1x128xf32> to vector<16x128xf32>
    %11 = arith.mulf %9, %10 : vector<16x128xf32>
    %c0_8 = arith.constant 0 : index
    %c0_9 = arith.constant 0 : index
    %12 = vector.load %arg5[%c0_8, %c0_9] : memref<16x1xf32, #tpu.memory_space<vmem>>, vector<16x1xf32>
    %13 = vector.broadcast %12 : vector<16x1xf32> to vector<16x128xf32>
    %14 = arith.addf %11, %13 : vector<16x128xf32>
    %cst = arith.constant 0.000000e+00 : f32
    %15 = vector.broadcast %cst : f32 to vector<32x128xf32>
    %c0_10 = arith.constant 0 : index
    %c0_11 = arith.constant 0 : index
    %c0_12 = arith.constant 0 : index
    %16 = vector.load %arg17[%c0_10, %c0_11, %c0_12] : memref<4x16x2xf32, #tpu.memory_space<vmem>>, vector<1x16x2xf32>
    %17 = vector.shape_cast %16 : vector<1x16x2xf32> to vector<16x2xf32>
    %18 = vector.extract_strided_slice %17 {offsets = [0, 1], sizes = [16, 1], strides = [1, 1]} : vector<16x2xf32> to vector<16x1xf32>
    %19 = vector.extract_strided_slice %14 {offsets = [0, 0], sizes = [16, 127], strides = [1, 1]} : vector<16x128xf32> to vector<16x127xf32>
    %20 = tpu.concatenate %18, %19 in 1 : vector<16x1xf32>, vector<16x127xf32> -> vector<16x128xf32>
    %21 = vector.extract_strided_slice %14 {offsets = [0, 126], sizes = [16, 2], strides = [1, 1]} : vector<16x128xf32> to vector<16x2xf32>
    %c0_13 = arith.constant 0 : index
    %c0_14 = arith.constant 0 : index
    %c0_15 = arith.constant 0 : index
    %22 = vector.load %arg17[%c0_13, %c0_14, %c0_15] : memref<4x16x2xf32, #tpu.memory_space<vmem>>, vector<1x16x2xf32>
    %23 = vector.shape_cast %22 : vector<1x16x2xf32> to vector<16x2xf32>
    %24 = vector.shape_cast %21 : vector<16x2xf32> to vector<1x16x2xf32>
    tpu.vector_store %arg17[%c0_13, %c0_14, %c0_15], %24 {strides = array<i32>} : memref<4x16x2xf32, #tpu.memory_space<vmem>>, vector<1x16x2xf32>,
    %c0_16 = arith.constant 0 : index
    %c0_17 = arith.constant 0 : index
    %c0_18 = arith.constant 0 : index
    %25 = vector.load %arg7[%c0_16, %c0_17, %c0_18] : memref<4x32x8xbf16, #tpu.memory_space<vmem>>, vector<1x32x8xbf16>
    %26 = vector.shape_cast %25 : vector<1x32x8xbf16> to vector<32x8xbf16>
    %cst_19 = arith.constant dense<0.000000e+00> : vector<32x128xf32>
    %27 = tpu.matmul %26, %7, %cst_19 {dimension_numbers = #tpu.dot_dimension_numbers<[1], [0], [0], [1], [0, 0, 1, 1], [], []>} : vector<32x8xbf16>, vector<8x128xbf16>, vector<32x128xf32> -> vector<32x128xf32>
    %c0_20 = arith.constant 0 : index
    %c0_21 = arith.constant 0 : index
    %c0_22 = arith.constant 0 : index
    %28 = vector.load %arg8[%c0_20, %c0_21, %c0_22] : memref<4x32x1xf32, #tpu.memory_space<vmem>>, vector<1x32x1xf32>
    %29 = vector.shape_cast %28 : vector<1x32x1xf32> to vector<32x1xf32>
    %30 = vector.broadcast %29 : vector<32x1xf32> to vector<32x128xf32>
    %31 = arith.addf %27, %30 : vector<32x128xf32>
    %32 = tpu.concatenate %20, %14 in 0 : vector<16x128xf32>, vector<16x128xf32> -> vector<32x128xf32>
    %33 = arith.truncf %32 : vector<32x128xf32> to vector<32x128xbf16>
    %c0_23 = arith.constant 0 : index
    %c0_24 = arith.constant 0 : index
    %c0_25 = arith.constant 0 : index
    %34 = vector.load %arg6[%c0_23, %c0_24, %c0_25] : memref<4x32x32xbf16, #tpu.memory_space<vmem>>, vector<1x32x32xbf16>
    %35 = vector.shape_cast %34 : vector<1x32x32xbf16> to vector<32x32xbf16>
    %cst_26 = arith.constant dense<0.000000e+00> : vector<32x128xf32>
    %36 = tpu.matmul %35, %33, %cst_26 {dimension_numbers = #tpu.dot_dimension_numbers<[1], [0], [0], [1], [0, 0, 1, 1], [], []>} : vector<32x32xbf16>, vector<32x128xbf16>, vector<32x128xf32> -> vector<32x128xf32>
    %37 = arith.addf %36, %31 : vector<32x128xf32>
    %38 = vector.extract_strided_slice %37 {offsets = [0, 0], sizes = [16, 128], strides = [1, 1]} : vector<32x128xf32> to vector<16x128xf32>
    %39 = math.tanh %38 : vector<16x128xf32>
    %40 = vector.extract_strided_slice %37 {offsets = [16, 0], sizes = [16, 128], strides = [1, 1]} : vector<32x128xf32> to vector<16x128xf32>
    %41 = arith.negf %40 : vector<16x128xf32>
    %42 = math.exp %41 : vector<16x128xf32>
    %cst_27 = arith.constant 1.000000e+00 : f32
    %43 = vector.broadcast %cst_27 : f32 to vector<16x128xf32>
    %44 = arith.addf %43, %42 : vector<16x128xf32>
    %45 = arith.divf %43, %44 : vector<16x128xf32>
    %46 = arith.mulf %39, %45 : vector<16x128xf32>
    %c0_28 = arith.constant 0 : index
    %c0_29 = arith.constant 0 : index
    %c0_30 = arith.constant 0 : index
    %47 = vector.load %arg9[%c0_28, %c0_29, %c0_30] : memref<4x48x16xbf16, #tpu.memory_space<vmem>>, vector<1x48x16xbf16>
    %48 = vector.shape_cast %47 : vector<1x48x16xbf16> to vector<48x16xbf16>
    %49 = arith.truncf %46 : vector<16x128xf32> to vector<16x128xbf16>
    %cst_31 = arith.constant dense<0.000000e+00> : vector<48x128xf32>
    %50 = tpu.matmul %48, %49, %cst_31 {dimension_numbers = #tpu.dot_dimension_numbers<[1], [0], [0], [1], [0, 0, 1, 1], [], []>} : vector<48x16xbf16>, vector<16x128xbf16>, vector<48x128xf32> -> vector<48x128xf32>
    %51 = vector.extract_strided_slice %50 {offsets = [0, 0], sizes = [32, 128], strides = [1, 1]} : vector<48x128xf32> to vector<32x128xf32>
    %52 = arith.addf %15, %51 : vector<32x128xf32>
    %53 = vector.extract_strided_slice %50 {offsets = [32, 0], sizes = [16, 128], strides = [1, 1]} : vector<48x128xf32> to vector<16x128xf32>
    %54 = arith.addf %14, %53 : vector<16x128xf32>
    %c0_32 = arith.constant 0 : index
    %c0_33 = arith.constant 0 : index
    %c0_34 = arith.constant 0 : index
    %55 = vector.load %arg10[%c0_32, %c0_33, %c0_34] : memref<4x16x1xf32, #tpu.memory_space<vmem>>, vector<1x16x1xf32>
    %56 = vector.shape_cast %55 : vector<1x16x1xf32> to vector<16x1xf32>
    %57 = vector.broadcast %56 : vector<16x1xf32> to vector<16x128xf32>
    %58 = arith.addf %54, %57 : vector<16x128xf32>
    %c1 = arith.constant 1 : index
    %c0_35 = arith.constant 0 : index
    %c0_36 = arith.constant 0 : index
    %59 = vector.load %arg17[%c1, %c0_35, %c0_36] : memref<4x16x2xf32, #tpu.memory_space<vmem>>, vector<1x16x2xf32>
    %60 = vector.shape_cast %59 : vector<1x16x2xf32> to vector<16x2xf32>
    %61 = vector.extract_strided_slice %58 {offsets = [0, 0], sizes = [16, 126], strides = [1, 1]} : vector<16x128xf32> to vector<16x126xf32>
    %62 = tpu.concatenate %60, %61 in 1 : vector<16x2xf32>, vector<16x126xf32> -> vector<16x128xf32>
    %63 = vector.extract_strided_slice %58 {offsets = [0, 126], sizes = [16, 2], strides = [1, 1]} : vector<16x128xf32> to vector<16x2xf32>
    %c1_37 = arith.constant 1 : index
    %c0_38 = arith.constant 0 : index
    %c0_39 = arith.constant 0 : index
    %64 = vector.load %arg17[%c1_37, %c0_38, %c0_39] : memref<4x16x2xf32, #tpu.memory_space<vmem>>, vector<1x16x2xf32>
    %65 = vector.shape_cast %64 : vector<1x16x2xf32> to vector<16x2xf32>
    %66 = vector.shape_cast %63 : vector<16x2xf32> to vector<1x16x2xf32>
    tpu.vector_store %arg17[%c1_37, %c0_38, %c0_39], %66 {strides = array<i32>} : memref<4x16x2xf32, #tpu.memory_space<vmem>>, vector<1x16x2xf32>,
    %c1_40 = arith.constant 1 : index
    %c0_41 = arith.constant 0 : index
    %c0_42 = arith.constant 0 : index
    %67 = vector.load %arg7[%c1_40, %c0_41, %c0_42] : memref<4x32x8xbf16, #tpu.memory_space<vmem>>, vector<1x32x8xbf16>
    %68 = vector.shape_cast %67 : vector<1x32x8xbf16> to vector<32x8xbf16>
    %cst_43 = arith.constant dense<0.000000e+00> : vector<32x128xf32>
    %69 = tpu.matmul %68, %7, %cst_43 {dimension_numbers = #tpu.dot_dimension_numbers<[1], [0], [0], [1], [0, 0, 1, 1], [], []>} : vector<32x8xbf16>, vector<8x128xbf16>, vector<32x128xf32> -> vector<32x128xf32>
    %c1_44 = arith.constant 1 : index
    %c0_45 = arith.constant 0 : index
    %c0_46 = arith.constant 0 : index
    %70 = vector.load %arg8[%c1_44, %c0_45, %c0_46] : memref<4x32x1xf32, #tpu.memory_space<vmem>>, vector<1x32x1xf32>
    %71 = vector.shape_cast %70 : vector<1x32x1xf32> to vector<32x1xf32>
    %72 = vector.broadcast %71 : vector<32x1xf32> to vector<32x128xf32>
    %73 = arith.addf %69, %72 : vector<32x128xf32>
    %74 = tpu.concatenate %62, %58 in 0 : vector<16x128xf32>, vector<16x128xf32> -> vector<32x128xf32>
    %75 = arith.truncf %74 : vector<32x128xf32> to vector<32x128xbf16>
    %c1_47 = arith.constant 1 : index
    %c0_48 = arith.constant 0 : index
    %c0_49 = arith.constant 0 : index
    %76 = vector.load %arg6[%c1_47, %c0_48, %c0_49] : memref<4x32x32xbf16, #tpu.memory_space<vmem>>, vector<1x32x32xbf16>
    %77 = vector.shape_cast %76 : vector<1x32x32xbf16> to vector<32x32xbf16>
    %cst_50 = arith.constant dense<0.000000e+00> : vector<32x128xf32>
    %78 = tpu.matmul %77, %75, %cst_50 {dimension_numbers = #tpu.dot_dimension_numbers<[1], [0], [0], [1], [0, 0, 1, 1], [], []>} : vector<32x32xbf16>, vector<32x128xbf16>, vector<32x128xf32> -> vector<32x128xf32>
    %79 = arith.addf %78, %73 : vector<32x128xf32>
    %80 = vector.extract_strided_slice %79 {offsets = [0, 0], sizes = [16, 128], strides = [1, 1]} : vector<32x128xf32> to vector<16x128xf32>
    %81 = math.tanh %80 : vector<16x128xf32>
    %82 = vector.extract_strided_slice %79 {offsets = [16, 0], sizes = [16, 128], strides = [1, 1]} : vector<32x128xf32> to vector<16x128xf32>
    %83 = arith.negf %82 : vector<16x128xf32>
    %84 = math.exp %83 : vector<16x128xf32>
    %cst_51 = arith.constant 1.000000e+00 : f32
    %85 = vector.broadcast %cst_51 : f32 to vector<16x128xf32>
    %86 = arith.addf %85, %84 : vector<16x128xf32>
    %87 = arith.divf %85, %86 : vector<16x128xf32>
    %88 = arith.mulf %81, %87 : vector<16x128xf32>
    %c1_52 = arith.constant 1 : index
    %c0_53 = arith.constant 0 : index
    %c0_54 = arith.constant 0 : index
    %89 = vector.load %arg9[%c1_52, %c0_53, %c0_54] : memref<4x48x16xbf16, #tpu.memory_space<vmem>>, vector<1x48x16xbf16>
    %90 = vector.shape_cast %89 : vector<1x48x16xbf16> to vector<48x16xbf16>
    %91 = arith.truncf %88 : vector<16x128xf32> to vector<16x128xbf16>
    %cst_55 = arith.constant dense<0.000000e+00> : vector<48x128xf32>
    %92 = tpu.matmul %90, %91, %cst_55 {dimension_numbers = #tpu.dot_dimension_numbers<[1], [0], [0], [1], [0, 0, 1, 1], [], []>} : vector<48x16xbf16>, vector<16x128xbf16>, vector<48x128xf32> -> vector<48x128xf32>
    %93 = vector.extract_strided_slice %92 {offsets = [0, 0], sizes = [32, 128], strides = [1, 1]} : vector<48x128xf32> to vector<32x128xf32>
    %94 = arith.addf %52, %93 : vector<32x128xf32>
    %95 = vector.extract_strided_slice %92 {offsets = [32, 0], sizes = [16, 128], strides = [1, 1]} : vector<48x128xf32> to vector<16x128xf32>
    %96 = arith.addf %58, %95 : vector<16x128xf32>
    %c1_56 = arith.constant 1 : index
    %c0_57 = arith.constant 0 : index
    %c0_58 = arith.constant 0 : index
    %97 = vector.load %arg10[%c1_56, %c0_57, %c0_58] : memref<4x16x1xf32, #tpu.memory_space<vmem>>, vector<1x16x1xf32>
    %98 = vector.shape_cast %97 : vector<1x16x1xf32> to vector<16x1xf32>
    %99 = vector.broadcast %98 : vector<16x1xf32> to vector<16x128xf32>
    %100 = arith.addf %96, %99 : vector<16x128xf32>
    %c2 = arith.constant 2 : index
    %c0_59 = arith.constant 0 : index
    %c0_60 = arith.constant 0 : index
    %101 = vector.load %arg17[%c2, %c0_59, %c0_60] : memref<4x16x2xf32, #tpu.memory_space<vmem>>, vector<1x16x2xf32>
    %102 = vector.shape_cast %101 : vector<1x16x2xf32> to vector<16x2xf32>
    %103 = vector.extract_strided_slice %102 {offsets = [0, 1], sizes = [16, 1], strides = [1, 1]} : vector<16x2xf32> to vector<16x1xf32>
    %104 = vector.extract_strided_slice %100 {offsets = [0, 0], sizes = [16, 127], strides = [1, 1]} : vector<16x128xf32> to vector<16x127xf32>
    %105 = tpu.concatenate %103, %104 in 1 : vector<16x1xf32>, vector<16x127xf32> -> vector<16x128xf32>
    %106 = vector.extract_strided_slice %100 {offsets = [0, 126], sizes = [16, 2], strides = [1, 1]} : vector<16x128xf32> to vector<16x2xf32>
    %c2_61 = arith.constant 2 : index
    %c0_62 = arith.constant 0 : index
    %c0_63 = arith.constant 0 : index
    %107 = vector.load %arg17[%c2_61, %c0_62, %c0_63] : memref<4x16x2xf32, #tpu.memory_space<vmem>>, vector<1x16x2xf32>
    %108 = vector.shape_cast %107 : vector<1x16x2xf32> to vector<16x2xf32>
    %109 = vector.shape_cast %106 : vector<16x2xf32> to vector<1x16x2xf32>
    tpu.vector_store %arg17[%c2_61, %c0_62, %c0_63], %109 {strides = array<i32>} : memref<4x16x2xf32, #tpu.memory_space<vmem>>, vector<1x16x2xf32>,
    %c2_64 = arith.constant 2 : index
    %c0_65 = arith.constant 0 : index
    %c0_66 = arith.constant 0 : index
    %110 = vector.load %arg7[%c2_64, %c0_65, %c0_66] : memref<4x32x8xbf16, #tpu.memory_space<vmem>>, vector<1x32x8xbf16>
    %111 = vector.shape_cast %110 : vector<1x32x8xbf16> to vector<32x8xbf16>
    %cst_67 = arith.constant dense<0.000000e+00> : vector<32x128xf32>
    %112 = tpu.matmul %111, %7, %cst_67 {dimension_numbers = #tpu.dot_dimension_numbers<[1], [0], [0], [1], [0, 0, 1, 1], [], []>} : vector<32x8xbf16>, vector<8x128xbf16>, vector<32x128xf32> -> vector<32x128xf32>
    %c2_68 = arith.constant 2 : index
    %c0_69 = arith.constant 0 : index
    %c0_70 = arith.constant 0 : index
    %113 = vector.load %arg8[%c2_68, %c0_69, %c0_70] : memref<4x32x1xf32, #tpu.memory_space<vmem>>, vector<1x32x1xf32>
    %114 = vector.shape_cast %113 : vector<1x32x1xf32> to vector<32x1xf32>
    %115 = vector.broadcast %114 : vector<32x1xf32> to vector<32x128xf32>
    %116 = arith.addf %112, %115 : vector<32x128xf32>
    %117 = tpu.concatenate %105, %100 in 0 : vector<16x128xf32>, vector<16x128xf32> -> vector<32x128xf32>
    %118 = arith.truncf %117 : vector<32x128xf32> to vector<32x128xbf16>
    %c2_71 = arith.constant 2 : index
    %c0_72 = arith.constant 0 : index
    %c0_73 = arith.constant 0 : index
    %119 = vector.load %arg6[%c2_71, %c0_72, %c0_73] : memref<4x32x32xbf16, #tpu.memory_space<vmem>>, vector<1x32x32xbf16>
    %120 = vector.shape_cast %119 : vector<1x32x32xbf16> to vector<32x32xbf16>
    %cst_74 = arith.constant dense<0.000000e+00> : vector<32x128xf32>
    %121 = tpu.matmul %120, %118, %cst_74 {dimension_numbers = #tpu.dot_dimension_numbers<[1], [0], [0], [1], [0, 0, 1, 1], [], []>} : vector<32x32xbf16>, vector<32x128xbf16>, vector<32x128xf32> -> vector<32x128xf32>
    %122 = arith.addf %121, %116 : vector<32x128xf32>
    %123 = vector.extract_strided_slice %122 {offsets = [0, 0], sizes = [16, 128], strides = [1, 1]} : vector<32x128xf32> to vector<16x128xf32>
    %124 = math.tanh %123 : vector<16x128xf32>
    %125 = vector.extract_strided_slice %122 {offsets = [16, 0], sizes = [16, 128], strides = [1, 1]} : vector<32x128xf32> to vector<16x128xf32>
    %126 = arith.negf %125 : vector<16x128xf32>
    %127 = math.exp %126 : vector<16x128xf32>
    %cst_75 = arith.constant 1.000000e+00 : f32
    %128 = vector.broadcast %cst_75 : f32 to vector<16x128xf32>
    %129 = arith.addf %128, %127 : vector<16x128xf32>
    %130 = arith.divf %128, %129 : vector<16x128xf32>
    %131 = arith.mulf %124, %130 : vector<16x128xf32>
    %c2_76 = arith.constant 2 : index
    %c0_77 = arith.constant 0 : index
    %c0_78 = arith.constant 0 : index
    %132 = vector.load %arg9[%c2_76, %c0_77, %c0_78] : memref<4x48x16xbf16, #tpu.memory_space<vmem>>, vector<1x48x16xbf16>
    %133 = vector.shape_cast %132 : vector<1x48x16xbf16> to vector<48x16xbf16>
    %134 = arith.truncf %131 : vector<16x128xf32> to vector<16x128xbf16>
    %cst_79 = arith.constant dense<0.000000e+00> : vector<48x128xf32>
    %135 = tpu.matmul %133, %134, %cst_79 {dimension_numbers = #tpu.dot_dimension_numbers<[1], [0], [0], [1], [0, 0, 1, 1], [], []>} : vector<48x16xbf16>, vector<16x128xbf16>, vector<48x128xf32> -> vector<48x128xf32>
    %136 = vector.extract_strided_slice %135 {offsets = [0, 0], sizes = [32, 128], strides = [1, 1]} : vector<48x128xf32> to vector<32x128xf32>
    %137 = arith.addf %94, %136 : vector<32x128xf32>
    %138 = vector.extract_strided_slice %135 {offsets = [32, 0], sizes = [16, 128], strides = [1, 1]} : vector<48x128xf32> to vector<16x128xf32>
    %139 = arith.addf %100, %138 : vector<16x128xf32>
    %c2_80 = arith.constant 2 : index
    %c0_81 = arith.constant 0 : index
    %c0_82 = arith.constant 0 : index
    %140 = vector.load %arg10[%c2_80, %c0_81, %c0_82] : memref<4x16x1xf32, #tpu.memory_space<vmem>>, vector<1x16x1xf32>
    %141 = vector.shape_cast %140 : vector<1x16x1xf32> to vector<16x1xf32>
    %142 = vector.broadcast %141 : vector<16x1xf32> to vector<16x128xf32>
    %143 = arith.addf %139, %142 : vector<16x128xf32>
    %c3 = arith.constant 3 : index
    %c0_83 = arith.constant 0 : index
    %c0_84 = arith.constant 0 : index
    %144 = vector.load %arg17[%c3, %c0_83, %c0_84] : memref<4x16x2xf32, #tpu.memory_space<vmem>>, vector<1x16x2xf32>
    %145 = vector.shape_cast %144 : vector<1x16x2xf32> to vector<16x2xf32>
    %146 = vector.extract_strided_slice %143 {offsets = [0, 0], sizes = [16, 126], strides = [1, 1]} : vector<16x128xf32> to vector<16x126xf32>
    %147 = tpu.concatenate %145, %146 in 1 : vector<16x2xf32>, vector<16x126xf32> -> vector<16x128xf32>
    %148 = vector.extract_strided_slice %143 {offsets = [0, 126], sizes = [16, 2], strides = [1, 1]} : vector<16x128xf32> to vector<16x2xf32>
    %c3_85 = arith.constant 3 : index
    %c0_86 = arith.constant 0 : index
    %c0_87 = arith.constant 0 : index
    %149 = vector.load %arg17[%c3_85, %c0_86, %c0_87] : memref<4x16x2xf32, #tpu.memory_space<vmem>>, vector<1x16x2xf32>
    %150 = vector.shape_cast %149 : vector<1x16x2xf32> to vector<16x2xf32>
    %151 = vector.shape_cast %148 : vector<16x2xf32> to vector<1x16x2xf32>
    tpu.vector_store %arg17[%c3_85, %c0_86, %c0_87], %151 {strides = array<i32>} : memref<4x16x2xf32, #tpu.memory_space<vmem>>, vector<1x16x2xf32>,
    %c3_88 = arith.constant 3 : index
    %c0_89 = arith.constant 0 : index
    %c0_90 = arith.constant 0 : index
    %152 = vector.load %arg7[%c3_88, %c0_89, %c0_90] : memref<4x32x8xbf16, #tpu.memory_space<vmem>>, vector<1x32x8xbf16>
    %153 = vector.shape_cast %152 : vector<1x32x8xbf16> to vector<32x8xbf16>
    %cst_91 = arith.constant dense<0.000000e+00> : vector<32x128xf32>
    %154 = tpu.matmul %153, %7, %cst_91 {dimension_numbers = #tpu.dot_dimension_numbers<[1], [0], [0], [1], [0, 0, 1, 1], [], []>} : vector<32x8xbf16>, vector<8x128xbf16>, vector<32x128xf32> -> vector<32x128xf32>
    %c3_92 = arith.constant 3 : index
    %c0_93 = arith.constant 0 : index
    %c0_94 = arith.constant 0 : index
    %155 = vector.load %arg8[%c3_92, %c0_93, %c0_94] : memref<4x32x1xf32, #tpu.memory_space<vmem>>, vector<1x32x1xf32>
    %156 = vector.shape_cast %155 : vector<1x32x1xf32> to vector<32x1xf32>
    %157 = vector.broadcast %156 : vector<32x1xf32> to vector<32x128xf32>
    %158 = arith.addf %154, %157 : vector<32x128xf32>
    %159 = tpu.concatenate %147, %143 in 0 : vector<16x128xf32>, vector<16x128xf32> -> vector<32x128xf32>
    %160 = arith.truncf %159 : vector<32x128xf32> to vector<32x128xbf16>
    %c3_95 = arith.constant 3 : index
    %c0_96 = arith.constant 0 : index
    %c0_97 = arith.constant 0 : index
    %161 = vector.load %arg6[%c3_95, %c0_96, %c0_97] : memref<4x32x32xbf16, #tpu.memory_space<vmem>>, vector<1x32x32xbf16>
    %162 = vector.shape_cast %161 : vector<1x32x32xbf16> to vector<32x32xbf16>
    %cst_98 = arith.constant dense<0.000000e+00> : vector<32x128xf32>
    %163 = tpu.matmul %162, %160, %cst_98 {dimension_numbers = #tpu.dot_dimension_numbers<[1], [0], [0], [1], [0, 0, 1, 1], [], []>} : vector<32x32xbf16>, vector<32x128xbf16>, vector<32x128xf32> -> vector<32x128xf32>
    %164 = arith.addf %163, %158 : vector<32x128xf32>
    %165 = vector.extract_strided_slice %164 {offsets = [0, 0], sizes = [16, 128], strides = [1, 1]} : vector<32x128xf32> to vector<16x128xf32>
    %166 = math.tanh %165 : vector<16x128xf32>
    %167 = vector.extract_strided_slice %164 {offsets = [16, 0], sizes = [16, 128], strides = [1, 1]} : vector<32x128xf32> to vector<16x128xf32>
    %168 = arith.negf %167 : vector<16x128xf32>
    %169 = math.exp %168 : vector<16x128xf32>
    %cst_99 = arith.constant 1.000000e+00 : f32
    %170 = vector.broadcast %cst_99 : f32 to vector<16x128xf32>
    %171 = arith.addf %170, %169 : vector<16x128xf32>
    %172 = arith.divf %170, %171 : vector<16x128xf32>
    %173 = arith.mulf %166, %172 : vector<16x128xf32>
    %c3_100 = arith.constant 3 : index
    %c0_101 = arith.constant 0 : index
    %c0_102 = arith.constant 0 : index
    %174 = vector.load %arg9[%c3_100, %c0_101, %c0_102] : memref<4x48x16xbf16, #tpu.memory_space<vmem>>, vector<1x48x16xbf16>
    %175 = vector.shape_cast %174 : vector<1x48x16xbf16> to vector<48x16xbf16>
    %176 = arith.truncf %173 : vector<16x128xf32> to vector<16x128xbf16>
    %cst_103 = arith.constant dense<0.000000e+00> : vector<48x128xf32>
    %177 = tpu.matmul %175, %176, %cst_103 {dimension_numbers = #tpu.dot_dimension_numbers<[1], [0], [0], [1], [0, 0, 1, 1], [], []>} : vector<48x16xbf16>, vector<16x128xbf16>, vector<48x128xf32> -> vector<48x128xf32>
    %178 = vector.extract_strided_slice %177 {offsets = [0, 0], sizes = [32, 128], strides = [1, 1]} : vector<48x128xf32> to vector<32x128xf32>
    %179 = arith.addf %137, %178 : vector<32x128xf32>
    %c0_104 = arith.constant 0 : index
    %c0_105 = arith.constant 0 : index
    %180 = vector.load %arg11[%c0_104, %c0_105] : memref<32x1xf32, #tpu.memory_space<vmem>>, vector<32x1xf32>
    %181 = vector.broadcast %180 : vector<32x1xf32> to vector<32x128xf32>
    %182 = arith.addf %179, %181 : vector<32x128xf32>
    %cst_106 = arith.constant 0.000000e+00 : f32
    %183 = vector.broadcast %cst_106 : f32 to vector<32x128xf32>
    %184 = arith.maximumf %182, %183 : vector<32x128xf32>
    %c0_107 = arith.constant 0 : index
    %c0_108 = arith.constant 0 : index
    %185 = vector.load %arg12[%c0_107, %c0_108] : memref<16x32xbf16, #tpu.memory_space<vmem>>, vector<16x32xbf16>
    %186 = arith.truncf %184 : vector<32x128xf32> to vector<32x128xbf16>
    %cst_109 = arith.constant dense<0.000000e+00> : vector<16x128xf32>
    %187 = tpu.matmul %185, %186, %cst_109 {dimension_numbers = #tpu.dot_dimension_numbers<[1], [0], [0], [1], [0, 0, 1, 1], [], []>} : vector<16x32xbf16>, vector<32x128xbf16>, vector<16x128xf32> -> vector<16x128xf32>
    %c0_110 = arith.constant 0 : index
    %c0_111 = arith.constant 0 : index
    %188 = vector.load %arg13[%c0_110, %c0_111] : memref<16x1xf32, #tpu.memory_space<vmem>>, vector<16x1xf32>
    %189 = vector.broadcast %188 : vector<16x1xf32> to vector<16x128xf32>
    %190 = arith.addf %187, %189 : vector<16x128xf32>
    %cst_112 = arith.constant 0.000000e+00 : f32
    %191 = vector.broadcast %cst_112 : f32 to vector<16x128xf32>
    %192 = arith.maximumf %190, %191 : vector<16x128xf32>
    %c0_113 = arith.constant 0 : index
    %c0_114 = arith.constant 0 : index
    %193 = vector.load %arg14[%c0_113, %c0_114] : memref<16x16xbf16, #tpu.memory_space<vmem>>, vector<16x16xbf16>
    %194 = arith.truncf %192 : vector<16x128xf32> to vector<16x128xbf16>
    %cst_115 = arith.constant dense<0.000000e+00> : vector<16x128xf32>
    %195 = tpu.matmul %193, %194, %cst_115 {dimension_numbers = #tpu.dot_dimension_numbers<[1], [0], [0], [1], [0, 0, 1, 1], [], []>} : vector<16x16xbf16>, vector<16x128xbf16>, vector<16x128xf32> -> vector<16x128xf32>
    %c0_116 = arith.constant 0 : index
    %c0_117 = arith.constant 0 : index
    %196 = vector.load %arg15[%c0_116, %c0_117] : memref<16x1xf32, #tpu.memory_space<vmem>>, vector<16x1xf32>
    %197 = vector.broadcast %196 : vector<16x1xf32> to vector<16x128xf32>
    %198 = arith.addf %195, %197 : vector<16x128xf32>
    %c0_118 = arith.constant 0 : index
    %c0_119 = arith.constant 0 : index
    %c0_120 = arith.constant 0 : index
    %199 = vector.load %arg16[%c0_118, %c0_119, %c0_120] : memref<1x16x128xf32, #tpu.memory_space<vmem>>, vector<1x16x128xf32>
    %200 = vector.shape_cast %199 : vector<1x16x128xf32> to vector<16x128xf32>
    %201 = vector.shape_cast %198 : vector<16x128xf32> to vector<1x16x128xf32>
    tpu.vector_store %arg16[%c0_118, %c0_119, %c0_120], %201 {strides = array<i32>} : memref<1x16x128xf32, #tpu.memory_space<vmem>>, vector<1x16x128xf32>,
    return
  }
  func.func @transform_0(%arg0: i32, %arg1: i32) -> (i32, i32, i32) {
    %c0_i32 = arith.constant 0 : i32
    %c0_i32_0 = arith.constant 0 : i32
    return %arg0, %c0_i32, %arg1 : i32, i32, i32
  }
  func.func @transform_1(%arg0: i32, %arg1: i32) -> (i32, i32, i32) {
    %c0_i32 = arith.constant 0 : i32
    %c0_i32_0 = arith.constant 0 : i32
    return %arg0, %c0_i32, %arg1 : i32, i32, i32
  }
  func.func @transform_2(%arg0: i32, %arg1: i32) -> (i32, i32) {
    %c0_i32 = arith.constant 0 : i32
    %c0_i32_0 = arith.constant 0 : i32
    %c0_i32_1 = arith.constant 0 : i32
    return %c0_i32, %c0_i32_0 : i32, i32
  }
  func.func @transform_3(%arg0: i32, %arg1: i32) -> (i32, i32) {
    %c0_i32 = arith.constant 0 : i32
    %c0_i32_0 = arith.constant 0 : i32
    %c0_i32_1 = arith.constant 0 : i32
    return %c0_i32, %c0_i32_0 : i32, i32
  }
  func.func @transform_4(%arg0: i32, %arg1: i32) -> (i32, i32, i32) {
    %c0_i32 = arith.constant 0 : i32
    %c0_i32_0 = arith.constant 0 : i32
    %c0_i32_1 = arith.constant 0 : i32
    %c0_i32_2 = arith.constant 0 : i32
    return %c0_i32, %c0_i32_0, %c0_i32_1 : i32, i32, i32
  }
  func.func @transform_5(%arg0: i32, %arg1: i32) -> (i32, i32, i32) {
    %c0_i32 = arith.constant 0 : i32
    %c0_i32_0 = arith.constant 0 : i32
    %c0_i32_1 = arith.constant 0 : i32
    %c0_i32_2 = arith.constant 0 : i32
    return %c0_i32, %c0_i32_0, %c0_i32_1 : i32, i32, i32
  }
  func.func @transform_6(%arg0: i32, %arg1: i32) -> (i32, i32, i32) {
    %c0_i32 = arith.constant 0 : i32
    %c0_i32_0 = arith.constant 0 : i32
    %c0_i32_1 = arith.constant 0 : i32
    %c0_i32_2 = arith.constant 0 : i32
    return %c0_i32, %c0_i32_0, %c0_i32_1 : i32, i32, i32
  }
  func.func @transform_7(%arg0: i32, %arg1: i32) -> (i32, i32, i32) {
    %c0_i32 = arith.constant 0 : i32
    %c0_i32_0 = arith.constant 0 : i32
    %c0_i32_1 = arith.constant 0 : i32
    %c0_i32_2 = arith.constant 0 : i32
    return %c0_i32, %c0_i32_0, %c0_i32_1 : i32, i32, i32
  }
  func.func @transform_8(%arg0: i32, %arg1: i32) -> (i32, i32, i32) {
    %c0_i32 = arith.constant 0 : i32
    %c0_i32_0 = arith.constant 0 : i32
    %c0_i32_1 = arith.constant 0 : i32
    %c0_i32_2 = arith.constant 0 : i32
    return %c0_i32, %c0_i32_0, %c0_i32_1 : i32, i32, i32
  }
  func.func @transform_9(%arg0: i32, %arg1: i32) -> (i32, i32) {
    %c0_i32 = arith.constant 0 : i32
    %c0_i32_0 = arith.constant 0 : i32
    %c0_i32_1 = arith.constant 0 : i32
    return %c0_i32, %c0_i32_0 : i32, i32
  }
  func.func @transform_10(%arg0: i32, %arg1: i32) -> (i32, i32) {
    %c0_i32 = arith.constant 0 : i32
    %c0_i32_0 = arith.constant 0 : i32
    %c0_i32_1 = arith.constant 0 : i32
    return %c0_i32, %c0_i32_0 : i32, i32
  }
  func.func @transform_11(%arg0: i32, %arg1: i32) -> (i32, i32) {
    %c0_i32 = arith.constant 0 : i32
    %c0_i32_0 = arith.constant 0 : i32
    %c0_i32_1 = arith.constant 0 : i32
    return %c0_i32, %c0_i32_0 : i32, i32
  }
  func.func @transform_12(%arg0: i32, %arg1: i32) -> (i32, i32) {
    %c0_i32 = arith.constant 0 : i32
    %c0_i32_0 = arith.constant 0 : i32
    %c0_i32_1 = arith.constant 0 : i32
    return %c0_i32, %c0_i32_0 : i32, i32
  }
  func.func @transform_13(%arg0: i32, %arg1: i32) -> (i32, i32) {
    %c0_i32 = arith.constant 0 : i32
    %c0_i32_0 = arith.constant 0 : i32
    %c0_i32_1 = arith.constant 0 : i32
    return %c0_i32, %c0_i32_0 : i32, i32
  }
  func.func @transform_14(%arg0: i32, %arg1: i32) -> (i32, i32, i32) {
    %c0_i32 = arith.constant 0 : i32
    %c0_i32_0 = arith.constant 0 : i32
    return %arg0, %c0_i32, %arg1 : i32, i32, i32
  }
}

</mosaic_0001>

<bundles_post_ra>
// kernel: tpu_custom_call.1
= control target key start
LH: loop header
LB: loop body
LE: loop exit
PB: predicated region body
PF: predicated region fallthrough
CT: control target
= control target key end

     0   :  { %s3321_s0 = inlined_call_operand.vmem [shape: bf16[2,1,256], index: 0, kind: input, shape index: {}]   ;;  %s3322_s1 = inlined_call_operand.vmem [shape: bf16[2,8,256], index: 1, kind: input, shape index: {}]   ;;  %s3323_s2 = inlined_call_operand.vmem [shape: f32[16,1], index: 2, kind: input, shape index: {}]   ;;  %s3324_s3 = inlined_call_operand.vmem [shape: f32[16,1], index: 3, kind: input, shape index: {}]   ;;  %s3325_s4 = inlined_call_operand.vmem [shape: bf16[4,32,32], index: 4, kind: input, shape index: {}]   ;;  %s3326_s5 = inlined_call_operand.vmem [shape: bf16[4,32,8], index: 5, kind: input, shape index: {}]   ;;  %s3327_s6 = inlined_call_operand.vmem [shape: f32[4,32,1], index: 6, kind: input, shape index: {}]   ;;  %s3328_s7 = inlined_call_operand.vmem [shape: bf16[4,48,16], index: 7, kind: input, shape index: {}]   ;;  %s3329_s8 = inlined_call_operand.vmem [shape: f32[4,16,1], index: 8, kind: input, shape index: {}]   ;;  %s3330_s9 = inlined_call_operand.vmem [shape: f32[32,1], index: 9, kind: input, shape index: {}]   ;;  %s3331_s10 = inlined_call_operand.vmem [shape: bf16[16,32], index: 10, kind: input, shape index: {}]   ;;  %s3332_s11 = inlined_call_operand.vmem [shape: f32[16,1], index: 11, kind: input, shape index: {}]   ;;  %s3333_s12 = inlined_call_operand.vmem [shape: bf16[16,16], index: 12, kind: input, shape index: {}]   ;;  %s3334_s13 = inlined_call_operand.vmem [shape: f32[16,1], index: 13, kind: input, shape index: {}]   ;;  %s3335_s14 = inlined_call_operand.hbm [shape: f32[2,16,256], index: 14, kind: output, shape index: {}]  }
   0x1   :  { %3348 = sst [smem:[#allocation16_spill]] %s3335_s14 }
   0x2   :  { %19 = vsyncpa [#allocation4], 0 }
   0x3   :  { %21 = vsyncpa [#allocation4 + $0x1], 0  ;;  %s2769_s29 = smov 0   ;;  %s2771_s30 = smov 0  }
   0x4   :  { %s2773_s15 = smov 0   ;;  %s2775_s16 = smov 0  }
   0x5   :  { %s2777_s17 = smov 0   ;;  %s2779_s18 = smov 0  }
   0x6   :  { %s2781_s19 = smov 0   ;;  %s2783_s20 = smov 0  }
   0x7 LB: > { %3349 = sst [smem:[#allocation6_spill]] %s2653_s29  ;;  %s2088_s21 = sadd.s32 4294967295, %s2681_s20   ;;  %s2681_s20 = sphi %s2783_s20, %s27_s20   ;;  %s2677_s19 = sphi %s2781_s19, %s3371_s19   ;;  %s2673_s18 = sphi %s2779_s18, %s3370_s18   ;;  %s2669_s17 = sphi %s2777_s17, %s3369_s17   ;;  %s2665_s16 = sphi %s2775_s16, %s3368_s16   ;;  %s2661_s15 = sphi %s2773_s15, %s3367_s15   ;;  %s2657_s30 = sphi %s2771_s30, %s3373_s30   ;;  %s2653_s29 = sphi %s2769_s29, %s3372_s29  }
   0x8   : > { %3350 = sst [smem:[#allocation7_spill]] %s2661_s15  ;;  %s2089_s22 = sadd.s32 4294967294, %s2681_s20  }
   0x9   : > { %3351 = sst [smem:[#allocation8_spill]] %s2673_s18  ;;  %s36_s23 = sadd.s32 1, %s2673_s18 }
   0xa   : > { %3352 = sst [smem:[#allocation9_spill]] %s2677_s19  ;;  %p37_p0 = scmp.ge.s32.totalorder %s36_s23, 2 }
   0xb   : > { %3353 = sst [smem:[#allocation10_spill]] %s2681_s20  ;;  %s39_s24 = sadd.s32 1, %s2677_s19 }
   0xc   : > { %p366_p1 = scmp.ne.s32.totalorder %s2661_s15, %s2657_s30  ;;  %p367_p2 = scmp.eq.s32.totalorder %s2088_s21, 3 }
   0xd   : > { %s3375_s23 = smov (%p37_p0, %s36_s23), 0  ;;  %s3377_s24 = smov (!%p37_p0, %s39_s24), %s2677_s19 }
   0xe   : > { %3354 = sst [smem:[#allocation11_spill]] %s3375_s23  ;;  %s352_s25 = ssub.s32 %s2673_s18, %s3375_s23 }
   0xf   : > { %p2820_p3 = por %p367_p2, %p366_p1  ;;  %p41_p4 = scmp.ge.s32.totalorder %s3377_s24, 2 }
  0x10   : > { %p372_p5 = scmp.ne.s32.totalorder %s2657_s30, %s2653_s29  ;;  %p373_p6 = scmp.eq.s32.totalorder %s2089_s22, 3 }
  0x11   : > { %s3355_s26 = scalar_select %p2820_p3, 1, 0 }
  0x12   : > { %p2092_p7 = scmp.ge.s32.totalorder %s2681_s20, 1  ;;  %s3379_s24 = smov (%p41_p4, %s3377_s24), 0 }
  0x13   : > { %3356 = sst [smem:[#allocation12_spill]] %s3355_s26  ;;  %p2829_p8 = por %p373_p6, %p372_p5 }
  0x14   : > { %3357 = sst [smem:[#allocation13_spill]] %s3379_s24  ;;  %p448_p9 = scmp.lt.s32.totalorder %s2681_s20, 5 }
  0x15   : > { %s3358_s27 = scalar_select %p2829_p8, 1, 0 }
  0x16   : > { %s351_s28 = ssub.s32 %s2677_s19, %s3379_s24  ;;  %s356_s21 = sadd.s32 1, %s2661_s15 }
  0x17   : > { %3359 = sst [smem:[#allocation14_spill]] %s3358_s27  ;;  %s353_s14 = sor.u32 %s352_s25, %s351_s28 }
  0x18   : > { %p449_p10 = pnand %p2092_p7, %p448_p9  ;;  %p354_p11 = scmp.eq.s32.totalorder %s353_s14, 0 }
  0x19   : > { %s501_s22 = sand.u32 (!%p449_p10), 1, %s2657_s30   ;;  %p504_p12 = scmp.lt.s32.totalorder (!%p449_p10), %s2669_s17, 1 }
  0x1a   : > { %s2838_s23 = scalar_select %p354_p11, %s2661_s15, %s356_s21  }
  0x1b   : > { %452 = sbr.rel (%p449_p10) target bundleno = 2918 (0xb66), region = 76  ;;  %s2093_s18 = sshll.u32 (!%p449_p10), %s501_s22, 4 }
  0x1c   : > { %3360 = sst [smem:[#allocation15_spill]] %s2838_s23  ;;  %p506_p13 = scmp.lt.s32.totalorder (!%p449_p10), %s2665_s16, 1 }
  0x1d   : > { %s2857_s26 = scalar_lea.vmem (!%p449_p10), [#allocation3], %s2093_s18  ;;  %p2097_p0 = scmp.ne.s32.totalorder (!%p449_p10), %s2665_s16, 0 }
  0x20   : > { %s505_s27 = scalar_select %p504_p12, %s2669_s17, 1 }
  0x21   : > { %s507_s24 = scalar_select %p506_p13, %s2665_s16, 1 }
  0x22   : > { %s2094_s19 = sshll.u32 %s505_s27, 1  ;;  %523 = sbr.rel (%p2097_p0) target bundleno = 44 (0x2c), region = 80 }
  0x23   : > { %s2847_s25 = sadd.s32 %s2094_s19, %s507_s24 }
  0x24   : > { %s510_s21 = scalar_lea.vmem %s3321_s0, %s2847_s25  ;;  %s2096_s23 = sshll.u32 %s2847_s25, 2 }
  0x25   : > { %s518_s20 = scalar_lea.vmem %s3322_s1, %s2096_s23 }
  0x27   : > { %vm524_vm0 = vcmask 15360   ;;  %v2683_v0 = vmov 0.0  }
  0x28   : > { %525 = vst.msk [vmem:[#allocation2] sm:$0xff] %vm524_vm0, %v2683_v0  ;;  %526 = vst.msk [vmem:[#allocation2 + $0x8] sm:$0xff] %vm524_vm0, %v2683_v0 }
  0x29   : > { %527 = vst.msk [vmem:[#allocation2 + $0x10] sm:$0xff] %vm524_vm0, %v2683_v0  ;;  %528 = vst.msk [vmem:[#allocation2 + $0x18] sm:$0xff] %vm524_vm0, %v2683_v0 }
  0x2a   : > { %529 = vst.msk [vmem:[#allocation2 + $0x20] sm:$0xff] %vm524_vm0, %v2683_v0  ;;  %530 = vst.msk [vmem:[#allocation2 + $0x28] sm:$0xff] %vm524_vm0, %v2683_v0 }
  0x2b   : > { %531 = vst.msk [vmem:[#allocation2 + $0x30] sm:$0xff] %vm524_vm0, %v2683_v0  ;;  %532 = vst.msk [vmem:[#allocation2 + $0x38] sm:$0xff] %vm524_vm0, %v2683_v0 }
  0x2c PF: > { %v2860_v1 = vld [vmem:[%s518_s20] sm:$0xf]  ;;  %vm643_vm1 = vcmask 1043456   ;;  %v2684_v4 = vmov 0   ;;  %vm636_vm2 = vcmask 64512   ;;  %v2512_v7 = vld [vmem:[%s3326_s5 + $0x8] sm:$0xff]   ;;  %v548_v16 = vlaneseq }
  0x2d   : > { %v554_v2 = vld [vmem:[%s3324_s3] sm:$0xff]  ;;  %2490 = vset.pattern.permute.xlu1 %v2684_v4  ;;  %2489 = vset.pattern.permute.xlu0 %v2684_v4  ;;  %v2870_v5 = vsel %vm643_vm1, %v2860_v1, 0  ;;  %v555_v8 = vld [vmem:[%s3324_s3 + $0x8] sm:$0xff]  ;;  %v604_v13 = vld [vmem:[%s3327_s6 + $0x10] sm:$0xff]  ;;  %s2685_s23 = smov 127   ;;  %vm712_vm3 = vcmask 261120  }
  0x2e   : > { %v536_v3 = vld [vmem:[%s3323_s2] sm:$0xff]  ;;  %2404 = vmatprep.subr.msk.bf16.mxu0 %vm643_vm1, %v2860_v1  ;;  %558 = vperm.xlu1 %2490, %v554_v2   ;;  %v537_v9 = vld [vmem:[%s3323_s2 + $0x8] sm:$0xff]  ;;  %v549_v17 = vshrl.u32 %v548_v16, 7  ;;  %s2686_s25 = smov 1   ;;  %v605_v33 = vld [vmem:[%s3327_s6 + $0x18] sm:$0xff]  ;;  %vm586_vm4 = vcmask 7168  }
  0x2f   : > { %v2511_v6 = vld [vmem:[%s3326_s5] sm:$0xff]   ;;  %540 = vperm.xlu0 %2489, %v536_v3   ;;  %2279 = vmatpush3.bf16.msra.mxu0 %v2870_v5  ;;  %v569_v11 = vld [vmem:[#allocation2 + $0x8] sm:$0xff]  ;;  %v2687_v46 = vmov 0.0   ;;  %vm2688_vm5 = vmmov 0   ;;  %v2518_v47 = vld [vmem:[%s3326_s5 + $0x10] sm:$0xff]   ;;  %vm806_vm6 = vcmask 130048  }
  0x30   : > { %2280 = vmatprep.mubr.msk.bf16.mxu0 %vm636_vm2, %v2511_v6  ;;  %v568_v10 = vld [vmem:[#allocation2] sm:$0xff]  ;;  %v550_v19 = vsub.s32 0, %v549_v17  ;;  %v603_v34 = vld [vmem:[%s3327_s6 + $0x8] sm:$0xff]  ;;  %2292 = vmatprep.subr.bf16.mxu0 %v2687_v46  ;;  %v2519_v48 = vld [vmem:[%s3326_s5 + $0x18] sm:$0xff]   ;;  %s2689_s27 = smov 2   ;;  %vm595_vm7 = vcmask 15360  }
  0x31   : > { %v2491_v12 = vpack.i.bf16 %v569_v11, %v568_v10  ;;  %v602_v14 = vld [vmem:[%s3327_s6] sm:$0xff]  ;;  %v880_v35 = vld [vmem:[%s3329_s8 + $0x8] sm:$0xff]  ;;  %s1992_s29 = sshll.u32 %s2857_s26, 4  ;;  %s2690_s19 = smov [#allocation3]   ;;  %s3264_s29 = int_to_ptr.vmem [resolvable:$true] %s1992_s29 }
  0x32   : > { %2281 = vmatmul.mubr.msk.bf16.vlgmr.msra.gmra.mxu0 %vm636_vm2, %v2512_v7  ;;  %563 = vperm.xlu1 %2490, %v555_v8   ;;  %v879_v15 = vld [vmem:[%s3329_s8] sm:$0xff]  ;;  %v2514_v45 = vld [vmem:[%s3325_s4 + $0x8] sm:$0xff]   ;;  %s2593_s24 = sshll.u32 %s2690_s19, 4  ;;  %s2594_s24 = int_to_ptr.vmem [resolvable:$false] %s2593_s24 }
  0x33   : > { %545 = vperm.xlu0 %2489, %v537_v9   ;;  %v533_v18 = vld [vmem:[%s510_s21] sm:$0x1]  ;;  %2294 = vmatprep.mubr.msk.bf16.mxu0 %vm2688_vm5, %v2687_v46  ;;  %s2595_s20 = scalar_lea.vmem %s2594_s24, 512  ;;  %p2596_p5 = scmp.lt.s32.totalorder %s3264_s29, %s2594_s24 }
  0x34   : > { %v534_v20 = vunpack.c.l.bf16 %v533_v18  ;;  %v2513_v26 = vld [vmem:[%s3325_s4] sm:$0xff]  }
  0x35   : > { %2288 = vmatprep.mubr.msk.bf16.mxu1 %vm712_vm3, %v2513_v26 }
  0x36   : > { %v551_v21 = vrot.slane %v534_v20, %v550_v19  ;;  %v2515_v20 = vld [vmem:[%s3328_s7] sm:$0xff]  }
  0x37   : > { %2492 = vrot.lane.b32.xlu0 %v2491_v12, %s2685_s23 }
  0x3b   : > { %618 = vperm.xlu0 %2489, %v604_v13  }
  0x3f   : > { %608 = vperm.xlu0 %2489, %v602_v14  }
  0x43   : > { %883 = vperm.xlu0 %2489, %v879_v15  }
  0xa9   : > { %v559_v22 = vpop.permute.xlu1 %558 }
  0xaa   : > { %v541_v23 = vpop.permute.xlu0 %540 }
  0xab   : > { %v552_v24 = vmul.f32 %v551_v21, %v541_v23  ;;  %v2520_v23 = vld [vmem:[%s3326_s5 + $0x20] sm:$0xff]  }
  0xad   : > { %v564_v28 = vpop.permute.xlu1 %563  ;;  %v2908_v29 = vadd.f32 %v559_v22, %v552_v24  ;;  %v2517_v22 = vld [vmem:[%s3328_s7 + $0x10] sm:$0xff]   ;;  %v2521_v24 = vld [vmem:[%s3326_s5 + $0x28] sm:$0xff]  }
  0xae   : > { %v546_v25 = vpop.permute.xlu0 %545 }
  0xaf   : > { %v553_v27 = vmul.f32 %v551_v21, %v546_v25  ;;  %v2516_v21 = vld [vmem:[%s3328_s7 + $0x8] sm:$0xff]  }
  0xb1   : > { %v2910_v30 = vadd.f32 %v564_v28, %v553_v27 }
  0xb2   : > { %v2493_v36 = vpop.permute.xlu0 %2492 }
  0xb3   : > { %v2496_v31 = vpack.i.bf16 %v2910_v30, %v2908_v29  ;;  %v697_v32 = vpack.c.bf16 %v2910_v30, %v2908_v29  ;;  %v2495_v37 = vunpack.i.h.bf16 %v2493_v36  ;;  %v2494_v38 = vunpack.i.l.bf16 %v2493_v36  ;;  %v2522_v36 = vld [vmem:[%s3325_s4 + $0x10] sm:$0xff]  }
  0xb5   : > { %2497 = vrot.lane.b32.xlu1 %v2496_v31, %s2686_s25  ;;  %2284 = vmatprep.subr.bf16.mxu1 %v697_v32 }
  0xb6   : > { %2285 = vmatpush3.bf16.msra.mxu1 %v697_v32  ;;  %v619_v51 = vpop.permute.xlu0 %618 }
  0xb9   : > { %623 = vperm.xlu1 %2490, %v605_v33  }
  0xba   : > { %v609_v63 = vpop.permute.xlu0 %608 }
  0xbd   : > { %613 = vperm.xlu1 %2490, %v603_v34  }
  0xc1   : > { %888 = vperm.xlu1 %2490, %v880_v35  }
  0xf2   : > { %v2282_v49 = vpop.f32.mrf.mxu0 }
  0xf3   : > { %v690_v52 = vadd.f32 %v2282_v49, %v619_v51  ;;  %v2118_v49 = vld [vmem:[%s3327_s6 + $0x20] sm:$0xff]  ;;  %v2148_v51 = vld [vmem:[%s3329_s8 + $0x10] sm:$0xff] }
  0xf4   : > { %v681_v50 = vpop.f32.mrf.mxu0 }
  0xf5   : > { %v682_v3 = vadd.f32 %v681_v50, %v609_v63  ;;  %v2121_v50 = vld [vmem:[%s3327_s6 + $0x38] sm:$0xff] }
  0xf6   : > { %v2283_v53 = vpop.f32.mrf.mxu0 }
  0xf8   : > { %v684_v0 = vpop.f32.mrf.mxu0 }
 0x127   : > { %v2498_v39 = vpop.permute.xlu1 %2497 }
 0x128   : > { %v2500_v40 = vunpack.i.h.bf16 %v2498_v39  ;;  %v2499_v41 = vunpack.i.l.bf16 %v2498_v39 }
 0x12a   : > { %v587_v42 = vsel %vm586_vm4, %v2494_v38, %v2499_v41  ;;  %v588_v43 = vsel %vm586_vm4, %v2495_v37, %v2500_v40  ;;  %v884_v38 = vpop.permute.xlu0 %883 }
 0x12b   : > { %v696_v44 = vpack.c.bf16 %v588_v43, %v587_v42 }
 0x12d   : > { %2286 = vmatprep.subr.bf16.mxu1 %v696_v44 }
 0x12e   : > { %2287 = vmatpush3.bf16.msra.mxu1 %v696_v44 }
 0x12f   : > { %2405 = vmatprep.subr.msk.bf16.mxu1 %vm643_vm1, %v2860_v1 }
 0x131   : > { %2289 = vmatmul.mubr.msk.bf16.vlgmr.msra.gmra.mxu1 %vm712_vm3, %v2514_v45  ;;  %v2120_v45 = vld [vmem:[%s3327_s6 + $0x30] sm:$0xff] }
 0x132   : > { %2307 = vmatpush3.bf16.msra.mxu1 %v2870_v5  ;;  %2308 = vmatprep.mubr.msk.bf16.mxu1 %vm636_vm2, %v2518_v47 }
 0x134   : > { %v624_v54 = vpop.permute.xlu1 %623 }
 0x135   : > { %v693_v58 = vadd.f32 %v2283_v53, %v624_v54  ;;  %v1202_v53 = vld [vmem:[#allocation2 + $0x20] sm:$0xff]  ;;  %v1203_v54 = vld [vmem:[#allocation2 + $0x28] sm:$0xff] }
 0x138   : > { %v614_v2 = vpop.permute.xlu1 %613 }
 0x139   : > { %2309 = vmatmul.mubr.msk.bf16.vlgmr.msra.gmra.mxu1 %vm636_vm2, %v2519_v48  ;;  %v685_v7 = vadd.f32 %v684_v0, %v614_v2 }
 0x13a   : > { %2316 = vmatprep.mubr.msk.bf16.mxu1 %vm712_vm3, %v2522_v36 }
 0x13c   : > { %v889_v43 = vpop.permute.xlu1 %888 }
 0x1f1   : > { %v2290_v55 = vpop.f32.mrf.mxu1 }
 0x1f2   : > { %v762_v56 = vadd.f32 %v2290_v55, %v690_v52  ;;  %v2119_v52 = vld [vmem:[%s3327_s6 + $0x28] sm:$0xff]  ;;  %v2501_v55 = vpack.i.bf16 %v1203_v54, %v1202_v53 }
 0x1f3   : > { %v753_v57 = vpop.f32.mrf.mxu1 }
 0x1f4   : > { %v2106_v59 = vmul.f32 -1.442695, %v762_v56  ;;  %v754_v8 = vadd.f32 %v753_v57, %v682_v3  ;;  %v2149_v56 = vld [vmem:[%s3329_s8 + $0x18] sm:$0xff]  ;;  %v2156_v57 = vld [vmem:[%s3327_s6 + $0x50] sm:$0xff] }
 0x1f5   : > { %v2291_v60 = vpop.f32.mrf.mxu1 }
 0x1f6   : > { %2541 = vpow2.f32 %v2106_v59  ;;  %v765_v61 = vadd.f32 %v2291_v60, %v693_v58  ;;  %v2154_v58 = vld [vmem:[%s3327_s6 + $0x40] sm:$0xff]  ;;  %v894_v60 = vld [vmem:[#allocation2 + $0x10] sm:$0xff] }
 0x1f7   : > { %v756_v4 = vpop.f32.mrf.mxu1  ;;  %v2184_v59 = vld [vmem:[%s3329_s8 + $0x20] sm:$0xff] }
 0x1f8   : > { %v2107_v62 = vmul.f32 -1.442695, %v765_v61  ;;  %v757_v10 = vadd.f32 %v756_v4, %v685_v7  ;;  %v2523_v4 = vld [vmem:[%s3325_s4 + $0x18] sm:$0xff]  }
 0x1fa   : > { %2543 = vpow2.f32 %v2107_v62  ;;  %v895_v62 = vld [vmem:[#allocation2 + $0x18] sm:$0xff] }
 0x1fb   : > { %2545 = vtanh.f32 %v754_v8 }
 0x203   : > { %v2542_v6 = vpop.eup %2541 }
 0x204   : > { %v776_v9 = vadd.f32 1.0, %v2542_v6  ;;  %v2310_v6 = vpop.f32.mrf.mxu1 }
 0x206   : > { %2547 = vrcp.f32 %v776_v9  ;;  %v988_v7 = vpop.f32.mrf.mxu1 }
 0x207   : > { %v2544_v11 = vpop.eup %2543  ;;  %2549 = vtanh.f32 %v757_v10 }
 0x208   : > { %v777_v12 = vadd.f32 1.0, %v2544_v11  ;;  %v2546_v13 = vpop.eup %2545  ;;  %v2311_v9 = vpop.f32.mrf.mxu1 }
 0x20a   : > { %2551 = vrcp.f32 %v777_v12  ;;  %v991_v10 = vpop.f32.mrf.mxu1 }
 0x213   : > { %v2548_v14 = vpop.eup %2547 }
 0x214   : > { %v2550_v15 = vpop.eup %2549  ;;  %v782_v17 = vmul.f32 %v2548_v14, %v2546_v13 }
 0x217   : > { %v2552_v16 = vpop.eup %2551 }
 0x218   : > { %v783_v18 = vmul.f32 %v2552_v16, %v2550_v15 }
 0x21a   : > { %v790_v19 = vpack.c.bf16 %v783_v18, %v782_v17 }
 0x21c   : > { %2293 = vmatpush3.bf16.msra.mxu0 %v790_v19 }
 0x21d   : > { %2406 = vmatprep.subr.msk.bf16.mxu0 %vm643_vm1, %v2860_v1 }
 0x21f   : > { %2295 = vmatmul.mubr.msk.bf16.vlgmr.msra.gmra.mxu0 %vm806_vm6, %v2515_v20 }
 0x220   : > { %2298 = vmatprep.mubr.msk.bf16.mxu0 %vm2688_vm5, %v2687_v46  ;;  %2335 = vmatpush3.bf16.msra.mxu0 %v2870_v5 }
 0x227   : > { %2299 = vmatmul.mubr.msk.bf16.gmra.mxu0 %vm806_vm6, %v2516_v21 }
 0x228   : > { %2302 = vmatprep.mubr.msk.bf16.mxu0 %vm2688_vm5, %v2687_v46 }
 0x22f   : > { %2303 = vmatmul.mubr.msk.bf16.gmra.mxu0 %vm806_vm6, %v2517_v22 }
 0x230   : > { %2336 = vmatprep.mubr.msk.bf16.mxu0 %vm636_vm2, %v2520_v23 }
 0x237   : > { %2337 = vmatmul.mubr.msk.bf16.vlgmr.msra.gmra.mxu0 %vm636_vm2, %v2521_v24 }
 0x2df   : > { %v2973_v25 = vpop.f32.mrf.mxu0 }
 0x2e1   : > { %v2296_v26 = vpop.f32.mrf.mxu0 }
 0x2e3   : > { %v2975_v27 = vpop.f32.mrf.mxu0 }
 0x2e5   : > { %v2297_v28 = vpop.f32.mrf.mxu0 }
 0x2e7   : > { %v2977_v31 = vpop.f32.mrf.mxu0 }
 0x2e9   : > { %v2300_v32 = vpop.f32.mrf.mxu0 }
 0x2eb   : > { %v2979_v33 = vpop.f32.mrf.mxu0 }
 0x2ed   : > { %v2301_v34 = vpop.f32.mrf.mxu0 }
 0x2ef   : > { %v866_v35 = vpop.f32.mrf.mxu0 }
 0x2f0   : > { %v877_v37 = vadd.f32 %v866_v35, %v2908_v29 }
 0x2f1   : > { %v2304_v39 = vpop.f32.mrf.mxu0 }
 0x2f2   : > { %v2986_v40 = vadd.f32 %v884_v38, %v877_v37 }
 0x2f3   : > { %v869_v41 = vpop.f32.mrf.mxu0 }
 0x2f4   : > { %v878_v42 = vadd.f32 %v869_v41, %v2910_v30  ;;  %898 = vrot.lane.b32.xlu0 %v2986_v40, %s2689_s27 }
 0x2f5   : > { %v2305_v44 = vpop.f32.mrf.mxu0 }
 0x2f6   : > { %v2994_v47 = vadd.f32 %v889_v43, %v878_v42 }
 0x2f8   : > { %930 = vperm.xlu0 %2489, %v2120_v45   ;;  %900 = vrot.lane.b32.xlu1 %v2994_v47, %s2689_s27  ;;  %v1004_v48 = vpack.c.bf16 %v2994_v47, %v2986_v40 }
 0x2fa   : > { %2312 = vmatprep.subr.bf16.mxu1 %v1004_v48 }
 0x2fb   : > { %2313 = vmatpush3.bf16.msra.mxu1 %v1004_v48  ;;  %v2524_v48 = vld [vmem:[%s3328_s7 + $0x18] sm:$0xff]  }
 0x2fc   : > { %920 = vperm.xlu0 %2489, %v2118_v49   ;;  %935 = vperm.xlu1 %2490, %v2121_v50   ;;  %v2525_v49 = vld [vmem:[%s3328_s7 + $0x20] sm:$0xff]  }
 0x300   : > { %1191 = vperm.xlu0 %2489, %v2148_v51   ;;  %925 = vperm.xlu1 %2490, %v2119_v52  }
 0x304   : > { %2502 = vrot.lane.b32.xlu0 %v2501_v55, %s2685_s23  ;;  %1196 = vperm.xlu1 %2490, %v2149_v56   ;;  %s2225_s23 = sshll.u32 %s2669_s17, 2  ;;  %s2589_s17 = scalar_lea.vmem %s3264_s29, 256 }
 0x305   : > { %s1989_s14 = sadd.s32 %s2665_s16, %s2225_s23  ;;  %s3270_s16 = scalar_lea.sflag [#allocation4], %s501_s22 }
 0x306   : > { %s2226_s28 = sshll.u32 %s1989_s14, 7  ;;  %p2590_p1 = scmp.ne.s32.totalorder %s3264_s29, %s2589_s17 }
 0x307   : > { %p2597_p6 = scmp.lt.s32.totalorder %s2595_s20, %s2589_s17 }
 0x308   : > { %1252 = vperm.xlu0 %2489, %v2156_v57   ;;  %p2591_p2 = pnand %p2590_p1, %p2820_p3 }
 0x309   : > { %p2598_p7 = por %p2597_p6, %p2596_p5 }
 0x30a   : > { %p2592_p4 = pneg %p2591_p2 }
 0x30c   : > { %1242 = vperm.xlu0 %2489, %v2154_v58   ;;  %p2599_p9 = pnand %p2598_p7, %p2592_p4 }
 0x310   : > { %1513 = vperm.xlu0 %2489, %v2184_v59  }
 0x366   : > { %v899_v61 = vpop.permute.xlu0 %898 }
 0x367   : > { %906 = vst.msk [vmem:[#allocation2 + $0x10] sm:$0xff] %vm595_vm7, %v899_v61  ;;  %v904_v0 = vsel %vm595_vm7, %v894_v60, %v899_v61  ;;  %v2527_v61 = vld [vmem:[%s3325_s4 + $0x20] sm:$0xff]  }
 0x368   : > { %2344 = vmatprep.mubr.msk.bf16.mxu0 %vm712_vm3, %v2527_v61 }
 0x36a   : > { %v901_v63 = vpop.permute.xlu1 %900 }
 0x36b   : > { %v905_v2 = vsel %vm595_vm7, %v895_v62, %v901_v63  ;;  %907 = vst.msk [vmem:[#allocation2 + $0x18] sm:$0xff] %vm595_vm7, %v901_v63 }
 0x36c   : > { %v1003_v3 = vpack.c.bf16 %v905_v2, %v904_v0 }
 0x36e   : > { %2314 = vmatprep.subr.bf16.mxu1 %v1003_v3 }
 0x36f   : > { %2315 = vmatpush3.bf16.msra.mxu1 %v1003_v3 }
 0x370   : > { %2320 = vmatprep.subr.bf16.mxu1 %v2687_v46 }
 0x372   : > { %2317 = vmatmul.mubr.msk.bf16.vlgmr.msra.gmra.mxu1 %vm712_vm3, %v2523_v4 }
 0x373   : > { %2322 = vmatprep.mubr.msk.bf16.mxu1 %vm2688_vm5, %v2687_v46  ;;  %v931_v8 = vpop.permute.xlu0 %930 }
 0x374   : > { %v997_v11 = vadd.f32 %v2310_v6, %v931_v8  ;;  %v2185_v8 = vld [vmem:[%s3329_s8 + $0x28] sm:$0xff] }
 0x377   : > { %v936_v12 = vpop.permute.xlu1 %935  ;;  %v921_v21 = vpop.permute.xlu0 %920 }
 0x378   : > { %v1000_v16 = vadd.f32 %v2311_v9, %v936_v12  ;;  %v989_v23 = vadd.f32 %v988_v7, %v921_v21  ;;  %v2155_v7 = vld [vmem:[%s3327_s6 + $0x48] sm:$0xff]  ;;  %v2338_v21 = vpop.f32.mrf.mxu0 }
 0x37b   : > { %v926_v22 = vpop.permute.xlu1 %925  ;;  %v1192_v62 = vpop.permute.xlu0 %1191 }
 0x37c   : > { %v992_v28 = vadd.f32 %v991_v10, %v926_v22  ;;  %v1310_v22 = vpop.f32.mrf.mxu0 }
 0x37f   : > { %v1197_v0 = vpop.permute.xlu1 %1196  ;;  %v2503_v9 = vpop.permute.xlu0 %2502 }
 0x380   : > { %v2505_v10 = vunpack.i.h.bf16 %v2503_v9 }
 0x432   : > { %v2318_v13 = vpop.f32.mrf.mxu1 }
 0x433   : > { %v1069_v14 = vadd.f32 %v2318_v13, %v997_v11  ;;  %v2504_v11 = vunpack.i.l.bf16 %v2503_v9 }
 0x434   : > { %v1060_v15 = vpop.f32.mrf.mxu1 }
 0x435   : > { %v2134_v17 = vmul.f32 -1.442695, %v1069_v14  ;;  %v1061_v32 = vadd.f32 %v1060_v15, %v989_v23  ;;  %v1253_v23 = vpop.permute.xlu0 %1252 }
 0x436   : > { %v2319_v18 = vpop.f32.mrf.mxu1 }
 0x437   : > { %2553 = vpow2.f32 %v2134_v17  ;;  %v1072_v19 = vadd.f32 %v2319_v18, %v1000_v16  ;;  %v2528_v18 = vld [vmem:[%s3325_s4 + $0x28] sm:$0xff]  }
 0x438   : > { %v1063_v24 = vpop.f32.mrf.mxu1 }
 0x439   : > { %v2135_v20 = vmul.f32 -1.442695, %v1072_v19  ;;  %v1064_v35 = vadd.f32 %v1063_v24, %v992_v28  ;;  %v2532_v19 = vld [vmem:[%s3326_s5 + $0x30] sm:$0xff]   ;;  %v2339_v24 = vpop.f32.mrf.mxu0  ;;  %v1319_v28 = vadd.f32 %v2338_v21, %v1253_v23 }
 0x43b   : > { %2555 = vpow2.f32 %v2135_v20  ;;  %v2533_v20 = vld [vmem:[%s3326_s5 + $0x38] sm:$0xff]  }
 0x43c   : > { %2557 = vtanh.f32 %v1061_v32 }
 0x444   : > { %v2554_v26 = vpop.eup %2553 }
 0x445   : > { %v1083_v34 = vadd.f32 1.0, %v2554_v26  ;;  %v1313_v26 = vpop.f32.mrf.mxu0 }
 0x447   : > { %2559 = vrcp.f32 %v1083_v34 }
 0x448   : > { %v2556_v36 = vpop.eup %2555  ;;  %2561 = vtanh.f32 %v1064_v35 }
 0x449   : > { %v1084_v37 = vadd.f32 1.0, %v2556_v36  ;;  %v2558_v38 = vpop.eup %2557 }
 0x44b   : > { %2563 = vrcp.f32 %v1084_v37 }
 0x454   : > { %v2560_v39 = vpop.eup %2559 }
 0x455   : > { %v2562_v41 = vpop.eup %2561  ;;  %v1089_v43 = vmul.f32 %v2560_v39, %v2558_v38 }
 0x458   : > { %v2564_v42 = vpop.eup %2563 }
 0x459   : > { %v1090_v44 = vmul.f32 %v2564_v42, %v2562_v41 }
 0x45b   : > { %v1098_v45 = vpack.c.bf16 %v1090_v44, %v1089_v43  ;;  %v1243_v43 = vpop.permute.xlu0 %1242 }
 0x45d   : > { %2321 = vmatpush3.bf16.msra.mxu1 %v1098_v45  ;;  %v1311_v45 = vadd.f32 %v1310_v22, %v1243_v43  ;;  %v1849_v43 = vld [vmem:[%s3332_s11 + $0x8] sm:$0xff] }
 0x45e   : > { %2407 = vmatprep.subr.msk.bf16.mxu1 %vm643_vm1, %v2860_v1  ;;  %v2526_v1 = vld [vmem:[%s3328_s7 + $0x28] sm:$0xff]  }
 0x45f   : > { %v1514_v21 = vpop.permute.xlu0 %1513 }
 0x460   : > { %2323 = vmatmul.mubr.msk.bf16.vlgmr.msra.gmra.mxu1 %vm806_vm6, %v2524_v48 }
 0x461   : > { %2326 = vmatprep.mubr.msk.bf16.mxu1 %vm2688_vm5, %v2687_v46  ;;  %2363 = vmatpush3.bf16.msra.mxu1 %v2870_v5 }
 0x468   : > { %2327 = vmatmul.mubr.msk.bf16.gmra.mxu1 %vm806_vm6, %v2525_v49 }
 0x469   : > { %2330 = vmatprep.mubr.msk.bf16.mxu1 %vm2688_vm5, %v2687_v46 }
 0x470   : > { %2331 = vmatmul.mubr.msk.bf16.gmra.mxu1 %vm806_vm6, %v2526_v1 }
 0x471   : > { %2364 = vmatprep.mubr.msk.bf16.mxu1 %vm636_vm2, %v2532_v19 }
 0x478   : > { %2365 = vmatmul.mubr.msk.bf16.vlgmr.msra.gmra.mxu1 %vm636_vm2, %v2533_v20 }
 0x520   : > { %v3055_v50 = vpop.f32.mrf.mxu1 }
 0x522   : > { %v2324_v51 = vpop.f32.mrf.mxu1 }
 0x524   : > { %v3057_v52 = vpop.f32.mrf.mxu1 }
 0x526   : > { %v2325_v5 = vpop.f32.mrf.mxu1 }
 0x528   : > { %v3059_v53 = vpop.f32.mrf.mxu1 }
 0x52a   : > { %v2328_v54 = vpop.f32.mrf.mxu1 }
 0x52c   : > { %v3061_v55 = vpop.f32.mrf.mxu1 }
 0x52e   : > { %v2329_v56 = vpop.f32.mrf.mxu1 }
 0x530   : > { %v1173_v57 = vpop.f32.mrf.mxu1 }
 0x531   : > { %v1184_v59 = vadd.f32 %v1173_v57, %v2986_v40 }
 0x532   : > { %v2332_v58 = vpop.f32.mrf.mxu1 }
 0x533   : > { %v3069_v3 = vadd.f32 %v1192_v62, %v1184_v59 }
 0x534   : > { %v1176_v60 = vpop.f32.mrf.mxu1 }
 0x535   : > { %v1185_v63 = vadd.f32 %v1176_v60, %v2994_v47  ;;  %v2157_v47 = vld [vmem:[%s3327_s6 + $0x58] sm:$0xff] }
 0x536   : > { %v2333_v2 = vpop.f32.mrf.mxu1 }
 0x537   : > { %v3071_v4 = vadd.f32 %v1197_v0, %v1185_v63  ;;  %v2529_v2 = vld [vmem:[%s3328_s7 + $0x30] sm:$0xff]  }
 0x539   : > { %v2506_v6 = vpack.i.bf16 %v3071_v4, %v3069_v3  ;;  %v1326_v40 = vpack.c.bf16 %v3071_v4, %v3069_v3 }
 0x53b   : > { %2507 = vrot.lane.b32.xlu1 %v2506_v6, %s2686_s25  ;;  %2340 = vmatprep.subr.bf16.mxu0 %v1326_v40  ;;  %v2530_v6 = vld [vmem:[%s3328_s7 + $0x38] sm:$0xff]   ;;  %s3362_s25 = sld [smem:[#allocation16_spill]] }
 0x53c   : > { %2341 = vmatpush3.bf16.msra.mxu0 %v1326_v40  ;;  %v2531_v40 = vld [vmem:[%s3328_s7 + $0x40] sm:$0xff]  }
 0x53f   : > { %1257 = vperm.xlu1 %2490, %v2157_v47   ;;  %v1180_v47 = vadd.f32 %v3055_v50, %v2973_v25  ;;  %v1183_v25 = vadd.f32 %v3061_v55, %v2979_v33 }
 0x541   : > { %s3262_s21 = scalar_lea.hbm %s3362_s25, %s2226_s28 }
 0x543   : > { %1247 = vperm.xlu1 %2490, %v2155_v7  }
 0x547   : > { %1518 = vperm.xlu1 %2490, %v2185_v8  }
 0x5ad   : > { %v2508_v12 = vpop.permute.xlu1 %2507 }
 0x5ae   : > { %v2510_v13 = vunpack.i.h.bf16 %v2508_v12  ;;  %v2509_v14 = vunpack.i.l.bf16 %v2508_v12 }
 0x5b0   : > { %v1220_v15 = vsel %vm586_vm4, %v2504_v11, %v2509_v14  ;;  %v1221_v16 = vsel %vm586_vm4, %v2505_v10, %v2510_v13  ;;  %v1181_v10 = vadd.f32 %v3057_v52, %v2975_v27  ;;  %v1182_v14 = vadd.f32 %v3059_v53, %v2977_v31  ;;  %v2534_v27 = vld [vmem:[%s3325_s4 + $0x30] sm:$0xff]  }
 0x5b1   : > { %v1325_v17 = vpack.c.bf16 %v1221_v16, %v1220_v15  ;;  %2372 = vmatprep.mubr.msk.bf16.mxu1 %vm712_vm3, %v2534_v27 }
 0x5b3   : > { %2342 = vmatprep.subr.bf16.mxu0 %v1325_v17 }
 0x5b4   : > { %2343 = vmatpush3.bf16.msra.mxu0 %v1325_v17 }
 0x5b5   : > { %2348 = vmatprep.subr.bf16.mxu0 %v2687_v46 }
 0x5b7   : > { %2345 = vmatmul.mubr.msk.bf16.vlgmr.msra.gmra.mxu0 %vm712_vm3, %v2528_v18 }
 0x5b8   : > { %2350 = vmatprep.mubr.msk.bf16.mxu0 %vm2688_vm5, %v2687_v46 }
 0x5ba   : > { %v1258_v32 = vpop.permute.xlu1 %1257 }
 0x5bb   : > { %v1322_v37 = vadd.f32 %v2339_v24, %v1258_v32  ;;  %v2192_v24 = vld [vmem:[%s3327_s6 + $0x70] sm:$0xff]  ;;  %v2190_v32 = vld [vmem:[%s3327_s6 + $0x60] sm:$0xff] }
 0x5be   : > { %v1248_v44 = vpop.permute.xlu1 %1247 }
 0x5bf   : > { %v1314_v1 = vadd.f32 %v1313_v26, %v1248_v44  ;;  %v1915_v44 = vld [vmem:[%s3334_s13 + $0x8] sm:$0xff] }
 0x5c2   : > { %v1519_v33 = vpop.permute.xlu1 %1518 }
 0x677   : > { %v2346_v34 = vpop.f32.mrf.mxu0 }
 0x678   : > { %v1391_v35 = vadd.f32 %v2346_v34, %v1319_v28  ;;  %v2193_v34 = vld [vmem:[%s3327_s6 + $0x78] sm:$0xff] }
 0x679   : > { %v1382_v36 = vpop.f32.mrf.mxu0 }
 0x67a   : > { %v2170_v38 = vmul.f32 -1.442695, %v1391_v35  ;;  %v1383_v51 = vadd.f32 %v1382_v36, %v1311_v45  ;;  %v1814_v35 = vld [vmem:[%s3330_s9 + $0x10] sm:$0xff]  ;;  %v2191_v36 = vld [vmem:[%s3327_s6 + $0x68] sm:$0xff] }
 0x67b   : > { %v2347_v39 = vpop.f32.mrf.mxu0  ;;  %v1524_v45 = vld [vmem:[#allocation2 + $0x30] sm:$0xff] }
 0x67c   : > { %2565 = vpow2.f32 %v2170_v38  ;;  %v1394_v41 = vadd.f32 %v2347_v39, %v1322_v37  ;;  %v1812_v37 = vld [vmem:[%s3330_s9] sm:$0xff]  ;;  %v1815_v38 = vld [vmem:[%s3330_s9 + $0x18] sm:$0xff] }
 0x67d   : > { %v1385_v48 = vpop.f32.mrf.mxu0  ;;  %v1848_v39 = vld [vmem:[%s3332_s11] sm:$0xff] }
 0x67e   : > { %v2171_v42 = vmul.f32 -1.442695, %v1394_v41  ;;  %v1386_v54 = vadd.f32 %v1385_v48, %v1314_v1  ;;  %v1813_v41 = vld [vmem:[%s3330_s9 + $0x8] sm:$0xff] }
 0x680   : > { %2567 = vpow2.f32 %v2171_v42  ;;  %v1914_v42 = vld [vmem:[%s3334_s13] sm:$0xff] }
 0x681   : > { %2569 = vtanh.f32 %v1383_v51 }
 0x689   : > { %v2566_v49 = vpop.eup %2565 }
 0x68a   : > { %v1405_v5 = vadd.f32 1.0, %v2566_v49  ;;  %v1525_v49 = vld [vmem:[#allocation2 + $0x38] sm:$0xff] }
 0x68c   : > { %2571 = vrcp.f32 %v1405_v5 }
 0x68d   : > { %v2568_v56 = vpop.eup %2567  ;;  %2573 = vtanh.f32 %v1386_v54 }
 0x68e   : > { %v1406_v57 = vadd.f32 1.0, %v2568_v56  ;;  %v2570_v58 = vpop.eup %2569 }
 0x690   : > { %2575 = vrcp.f32 %v1406_v57 }
 0x699   : > { %v2572_v59 = vpop.eup %2571 }
 0x69a   : > { %v2574_v60 = vpop.eup %2573  ;;  %v1411_v62 = vmul.f32 %v2572_v59, %v2570_v58 }
 0x69d   : > { %v2576_v61 = vpop.eup %2575 }
 0x69e   : > { %v1412_v63 = vmul.f32 %v2576_v61, %v2574_v60 }
 0x6a0   : > { %v1420_v0 = vpack.c.bf16 %v1412_v63, %v1411_v62 }
 0x6a2   : > { %2349 = vmatpush3.bf16.msra.mxu0 %v1420_v0 }
 0x6a3   : > { %2390 = vmatprep.subr.bf16.mxu0 %v2687_v46 }
 0x6a5   : > { %2351 = vmatmul.mubr.msk.bf16.vlgmr.msra.gmra.mxu0 %vm806_vm6, %v2529_v2 }
 0x6a6   : > { %2354 = vmatprep.mubr.msk.bf16.mxu0 %vm2688_vm5, %v2687_v46 }
 0x6ad   : > { %2355 = vmatmul.mubr.msk.bf16.gmra.mxu0 %vm806_vm6, %v2530_v6 }
 0x6ae   : > { %2358 = vmatprep.mubr.msk.bf16.mxu0 %vm2688_vm5, %v2687_v46 }
 0x6b5   : > { %2359 = vmatmul.mubr.msk.bf16.gmra.mxu0 %vm806_vm6, %v2531_v40 }
 0x6b6   : > { %2394 = vmatprep.mubr.msk.bf16.mxu0 %vm2688_vm5, %v2687_v46 }
 0x765   : > { %v1479_v7 = vpop.f32.mrf.mxu0 }
 0x766   : > { %v3125_v8 = vadd.f32 %v1479_v7, %v1180_v47  ;;  %v2366_v7 = vpop.f32.mrf.mxu1 }
 0x767   : > { %v2352_v9 = vpop.f32.mrf.mxu0 }
 0x768   : > { %v1618_v9 = vpop.f32.mrf.mxu1 }
 0x769   : > { %v1482_v11 = vpop.f32.mrf.mxu0 }
 0x76a   : > { %v3129_v12 = vadd.f32 %v1482_v11, %v1181_v10  ;;  %v2367_v10 = vpop.f32.mrf.mxu1 }
 0x76b   : > { %v2353_v13 = vpop.f32.mrf.mxu0 }
 0x76c   : > { %v1621_v11 = vpop.f32.mrf.mxu1 }
 0x76d   : > { %v1487_v15 = vpop.f32.mrf.mxu0 }
 0x76e   : > { %v3133_v16 = vadd.f32 %v1487_v15, %v1182_v14 }
 0x76f   : > { %v2356_v17 = vpop.f32.mrf.mxu0 }
 0x771   : > { %v1490_v50 = vpop.f32.mrf.mxu0 }
 0x772   : > { %v3137_v18 = vadd.f32 %v1490_v50, %v1183_v25 }
 0x773   : > { %v2357_v19 = vpop.f32.mrf.mxu0 }
 0x775   : > { %v1495_v20 = vpop.f32.mrf.mxu0 }
 0x776   : > { %v1506_v52 = vadd.f32 %v1495_v20, %v3069_v3 }
 0x777   : > { %v2360_v31 = vpop.f32.mrf.mxu0 }
 0x778   : > { %v1521_v53 = vadd.f32 %v1514_v21, %v1506_v52 }
 0x779   : > { %v1498_v22 = vpop.f32.mrf.mxu0 }
 0x77a   : > { %v1507_v23 = vadd.f32 %v1498_v22, %v3071_v4  ;;  %1528 = vrot.lane.b32.xlu0 %v1521_v53, %s2689_s27 }
 0x77b   : > { %v2361_v55 = vpop.f32.mrf.mxu0 }
 0x77c   : > { %v1522_v26 = vadd.f32 %v1519_v33, %v1507_v23 }
 0x77e   : > { %1560 = vperm.xlu0 %2489, %v2192_v24   ;;  %1530 = vrot.lane.b32.xlu1 %v1522_v26, %s2689_s27  ;;  %v1634_v28 = vpack.c.bf16 %v1522_v26, %v1521_v53 }
 0x780   : > { %2368 = vmatprep.subr.bf16.mxu1 %v1634_v28 }
 0x781   : > { %2369 = vmatpush3.bf16.msra.mxu1 %v1634_v28 }
 0x782   : > { %1550 = vperm.xlu0 %2489, %v2190_v32   ;;  %1565 = vperm.xlu1 %2490, %v2193_v34  }
 0x786   : > { %1828 = vperm.xlu0 %2489, %v1814_v35   ;;  %1555 = vperm.xlu1 %2490, %v2191_v36  }
 0x78a   : > { %1818 = vperm.xlu0 %2489, %v1812_v37   ;;  %1833 = vperm.xlu1 %2490, %v1815_v38   ;;  %v2536_v38 = vld [vmem:[%s3328_s7 + $0x48] sm:$0xff]  }
 0x78e   : > { %1852 = vperm.xlu0 %2489, %v1848_v39   ;;  %1823 = vperm.xlu1 %2490, %v1813_v41   ;;  %v2537_v39 = vld [vmem:[%s3328_s7 + $0x50] sm:$0xff]  }
 0x792   : > { %1918 = vperm.xlu0 %2489, %v1914_v42   ;;  %1857 = vperm.xlu1 %2490, %v1849_v43  }
 0x796   : > { %589 = vrot.lane.b32.xlu0 %v2908_v29, %s2689_s27  ;;  %1923 = vperm.xlu1 %2490, %v1915_v44  }
 0x79a   : > { %1222 = vrot.lane.b32.xlu0 %v3069_v3, %s2689_s27  ;;  %591 = vrot.lane.b32.xlu1 %v2910_v30, %s2689_s27  ;;  %v2535_v30 = vld [vmem:[%s3325_s4 + $0x38] sm:$0xff]  }
 0x79e   : > { %1224 = vrot.lane.b32.xlu1 %v3071_v4, %s2689_s27 }
 0x7ec   : > { %v1529_v48 = vpop.permute.xlu0 %1528 }
 0x7ed   : > { %1536 = vst.msk [vmem:[#allocation2 + $0x30] sm:$0xff] %vm595_vm7, %v1529_v48  ;;  %v1534_v51 = vsel %vm595_vm7, %v1524_v45, %v1529_v48 }
 0x7f0   : > { %v1531_v1 = vpop.permute.xlu1 %1530 }
 0x7f1   : > { %v1535_v29 = vsel %vm595_vm7, %v1525_v49, %v1531_v1  ;;  %1537 = vst.msk [vmem:[#allocation2 + $0x38] sm:$0xff] %vm595_vm7, %v1531_v1 }
 0x7f2   : > { %v1633_v5 = vpack.c.bf16 %v1535_v29, %v1534_v51 }
 0x7f4   : > { %2370 = vmatprep.subr.bf16.mxu1 %v1633_v5 }
 0x7f5   : > { %2371 = vmatpush3.bf16.msra.mxu1 %v1633_v5 }
 0x7f6   : > { %2376 = vmatprep.subr.bf16.mxu1 %v2687_v46 }
 0x7f8   : > { %2373 = vmatmul.mubr.msk.bf16.vlgmr.msra.gmra.mxu1 %vm712_vm3, %v2535_v30 }
 0x7f9   : > { %v1561_v3 = vpop.permute.xlu0 %1560  ;;  %2378 = vmatprep.mubr.msk.bf16.mxu1 %vm2688_vm5, %v2687_v46 }
 0x7fa   : > { %v1627_v13 = vadd.f32 %v2366_v7, %v1561_v3 }
 0x7fd   : > { %v1551_v4 = vpop.permute.xlu0 %1550  ;;  %v1566_v54 = vpop.permute.xlu1 %1565 }
 0x7fe   : > { %v1630_v25 = vadd.f32 %v2367_v10, %v1566_v54  ;;  %v1619_v52 = vadd.f32 %v1618_v9, %v1551_v4 }
 0x801   : > { %v3202_v56 = vpop.permute.xlu0 %1828  ;;  %v1556_v57 = vpop.permute.xlu1 %1555 }
 0x802   : > { %v1622_v22 = vadd.f32 %v1621_v11, %v1556_v57 }
 0x805   : > { %v1819_v58 = vpop.permute.xlu0 %1818  ;;  %v3204_v59 = vpop.permute.xlu1 %1833 }
 0x809   : > { %v3206_v60 = vpop.permute.xlu0 %1852  ;;  %v1824_v61 = vpop.permute.xlu1 %1823 }
 0x80d   : > { %v3208_v62 = vpop.permute.xlu0 %1918  ;;  %v3210_v63 = vpop.permute.xlu1 %1857 }
 0x811   : > { %v590_v0 = vpop.permute.xlu0 %589  ;;  %v3212_v2 = vpop.permute.xlu1 %1923 }
 0x812   : > { %596 = vst.msk [vmem:[#allocation2] sm:$0xff] %vm595_vm7, %v590_v0 }
 0x815   : > { %v1223_v6 = vpop.permute.xlu0 %1222  ;;  %v592_v40 = vpop.permute.xlu1 %591 }
 0x816   : > { %1228 = vst.msk [vmem:[#allocation2 + $0x20] sm:$0xff] %vm595_vm7, %v1223_v6  ;;  %597 = vst.msk [vmem:[#allocation2 + $0x8] sm:$0xff] %vm595_vm7, %v592_v40 }
 0x819   : > { %v1225_v47 = vpop.permute.xlu1 %1224 }
 0x81a   : > { %1229 = vst.msk [vmem:[#allocation2 + $0x28] sm:$0xff] %vm595_vm7, %v1225_v47 }
 0x8b8   : > { %v2374_v14 = vpop.f32.mrf.mxu1 }
 0x8b9   : > { %v1699_v15 = vadd.f32 %v2374_v14, %v1627_v13  ;;  %v2539_v13 = vld [vmem:[%s3333_s12] sm:$0xff]  }
 0x8ba   : > { %v1690_v17 = vpop.f32.mrf.mxu1 }
 0x8bb   : > { %v2206_v50 = vmul.f32 -1.442695, %v1699_v15  ;;  %v1691_v21 = vadd.f32 %v1690_v17, %v1619_v52 }
 0x8bc   : > { %v2375_v19 = vpop.f32.mrf.mxu1 }
 0x8bd   : > { %2577 = vpow2.f32 %v2206_v50  ;;  %v1702_v20 = vadd.f32 %v2375_v19, %v1630_v25 }
 0x8be   : > { %v1693_v31 = vpop.f32.mrf.mxu1 }
 0x8bf   : > { %v2207_v27 = vmul.f32 -1.442695, %v1702_v20  ;;  %v1694_v33 = vadd.f32 %v1693_v31, %v1622_v22 }
 0x8c1   : > { %2579 = vpow2.f32 %v2207_v27 }
 0x8c2   : > { %2581 = vtanh.f32 %v1691_v21 }
 0x8ca   : > { %v2578_v53 = vpop.eup %2577 }
 0x8cb   : > { %v1713_v23 = vadd.f32 1.0, %v2578_v53 }
 0x8cd   : > { %2583 = vrcp.f32 %v1713_v23 }
 0x8ce   : > { %v2580_v55 = vpop.eup %2579  ;;  %2585 = vtanh.f32 %v1694_v33 }
 0x8cf   : > { %v1714_v24 = vadd.f32 1.0, %v2580_v55  ;;  %v2582_v26 = vpop.eup %2581 }
 0x8d1   : > { %2587 = vrcp.f32 %v1714_v24 }
 0x8da   : > { %v2584_v28 = vpop.eup %2583 }
 0x8db   : > { %v1719_v32 = vmul.f32 %v2584_v28, %v2582_v26  ;;  %v2586_v34 = vpop.eup %2585 }
 0x8de   : > { %v2588_v35 = vpop.eup %2587 }
 0x8df   : > { %v1720_v36 = vmul.f32 %v2588_v35, %v2586_v34 }
 0x8e1   : > { %v1728_v37 = vpack.c.bf16 %v1720_v36, %v1719_v32 }
 0x8e3   : > { %2377 = vmatpush3.bf16.msra.mxu1 %v1728_v37 }
 0x8e6   : > { %2379 = vmatmul.mubr.msk.bf16.vlgmr.msra.gmra.mxu1 %vm806_vm6, %v2536_v38 }
 0x8e7   : > { %2382 = vmatprep.mubr.msk.bf16.mxu1 %vm2688_vm5, %v2687_v46 }
 0x8ee   : > { %2383 = vmatmul.mubr.msk.bf16.gmra.mxu1 %vm806_vm6, %v2537_v39 }
 0x8ef   : > { %2386 = vmatprep.mubr.msk.bf16.mxu1 %vm2688_vm5, %v2687_v46 }
 0x9a6   : > { %v1787_v41 = vpop.f32.mrf.mxu1 }
 0x9a7   : > { %v1808_v42 = vadd.f32 %v1787_v41, %v3125_v8 }
 0x9a8   : > { %v2380_v43 = vpop.f32.mrf.mxu1 }
 0x9a9   : > { %v1836_v45 = vadd.f32 %v1819_v58, %v1808_v42 }
 0x9aa   : > { %v1790_v44 = vpop.f32.mrf.mxu1 }
 0x9ab   : > { %v1809_v48 = vadd.f32 %v1790_v44, %v3129_v12  ;;  %v1840_v29 = vmax.f32 %v1836_v45, 0.0 }
 0x9ac   : > { %v2381_v49 = vpop.f32.mrf.mxu1 }
 0x9ad   : > { %v1837_v1 = vadd.f32 %v1824_v61, %v1809_v48 }
 0x9ae   : > { %v1795_v51 = vpop.f32.mrf.mxu1 }
 0x9af   : > { %v1841_v5 = vmax.f32 %v1837_v1, 0.0  ;;  %v1810_v30 = vadd.f32 %v1795_v51, %v3133_v16  ;;  %v2538_v16 = vld [vmem:[%s3331_s10] sm:$0xff]  }
 0x9b0   : > { %v2384_v3 = vpop.f32.mrf.mxu1 }
 0x9b1   : > { %v1846_v4 = vpack.c.bf16 %v1841_v5, %v1840_v29  ;;  %v1838_v57 = vadd.f32 %v3202_v56, %v1810_v30 }
 0x9b2   : > { %v1798_v54 = vpop.f32.mrf.mxu1 }
 0x9b3   : > { %v1811_v0 = vadd.f32 %v1798_v54, %v3137_v18  ;;  %v1842_v58 = vmax.f32 %v1838_v57, 0.0  ;;  %v2540_v18 = vld [vmem:[%s3328_s7 + $0x58] sm:$0xff]  }
 0x9b4   : > { %v2385_v8 = vpop.f32.mrf.mxu1  ;;  %2387 = vmatmul.mubr.msk.bf16.gmra.mxu1 %vm806_vm6, %v2540_v18 }
 0x9b5   : > { %v1839_v6 = vadd.f32 %v3204_v59, %v1811_v0 }
 0x9b7   : > { %v1843_v40 = vmax.f32 %v1839_v6, 0.0 }
 0x9b9   : > { %v1847_v12 = vpack.c.bf16 %v1843_v40, %v1842_v58 }
 0x9bb   : > { %2391 = vmatpush3.bf16.msra.mxu0 %v1847_v12 }
 0x9bc   : > { %2392 = vmatprep.subr.bf16.mxu0 %v2687_v46 }
 0x9bf   : > { %2393 = vmatpush3.bf16.msra.mxu0 %v1846_v4 }
 0x9c0   : > { %2398 = vmatprep.subr.bf16.mxu0 %v2687_v46 }
 0x9c2   : > { %2395 = vmatmul.mubr.msk.bf16.vlgmr.msra.gmra.mxu0 %vm712_vm3, %v2538_v16 }
 0x9c3   : > { %2400 = vmatprep.mubr.msk.bf16.mxu0 %vm2688_vm5, %v2687_v46 }
 0xa74   : > { %v1803_v14 = vpop.f32.mrf.mxu1 }
 0xa76   : > { %v2388_v15 = vpop.f32.mrf.mxu1 }
 0xa82   : > { %v1902_v56 = vpop.f32.mrf.mxu0 }
 0xa83   : > { %v1903_v61 = vadd.f32 %v1902_v56, %v3206_v60  ;;  %v1805_v60 = vpop.f32.mrf.mxu1 }
 0xa84   : > { %v2396_v59 = vpop.f32.mrf.mxu0 }
 0xa85   : > { %v1909_v10 = vmax.f32 %v1903_v61, 0.0  ;;  %v2389_v17 = vpop.f32.mrf.mxu1 }
 0xa86   : > { %v1905_v47 = vpop.f32.mrf.mxu0 }
 0xa87   : > { %v1906_v7 = vadd.f32 %v1905_v47, %v3210_v63 }
 0xa88   : > { %v2397_v9 = vpop.f32.mrf.mxu0 }
 0xa89   : > { %v1910_v11 = vmax.f32 %v1906_v7, 0.0 }
 0xa8b   : > { %v1913_v46 = vpack.c.bf16 %v1910_v11, %v1909_v10 }
 0xa8d   : > { %2399 = vmatpush3.bf16.msra.mxu0 %v1913_v46 }
 0xa90   : > { %2401 = vmatmul.mubr.msk.bf16.vlgmr.msra.gmra.mxu0 %vm806_vm6, %v2539_v13 }
 0xb50   : > { %v1968_v63 = vpop.f32.mrf.mxu0 }
 0xb51   : > { %v1969_v25 = vadd.f32 %v1968_v63, %v3208_v62 }
 0xb52   : > { %v2402_v50 = vpop.f32.mrf.mxu0 }
 0xb53   : > { %1975 = vst [vmem:[%s2857_s26] sm:$0xff] %v1969_v25 }
 0xb54   : > { %v1971_v19 = vpop.f32.mrf.mxu0 }
 0xb55   : > { %v1972_v20 = vadd.f32 %v1971_v19, %v3212_v2 }
 0xb56   : > { %v2403_v27 = vpop.f32.mrf.mxu0 }
 0xb57   : > { %1976 = vst [vmem:[%s2857_s26 + $0x8] sm:$0xff] %v1972_v20 }
 0xb58   : > { %2602 = shalt.err (!%p2599_p9)
}
 0xb59   : > { %s2603_s26 = scalar_lea.hbm %s3262_s21, 256  ;;  %s2607_s14 = scalar_lea.hbm %s3362_s25, 1024 }
 0xb5a   : > { %p2604_p10 = scmp.ne.s32.totalorder %s3262_s21, %s2603_s26  ;;  %p2608_p13 = scmp.lt.s32.totalorder %s3262_s21, %s3362_s25 }
 0xb5b   : > { %p2609_p0 = scmp.lt.s32.totalorder %s2607_s14, %s2603_s26 }
 0xb5c   : > { %p2605_p11 = pnand %p2604_p10, %p2820_p3 }
 0xb5d   : > { %p2610_p1 = por %p2609_p0, %p2608_p13 }
 0xb5e   : > { %p2606_p12 = pneg %p2605_p11 }
 0xb60   : > { %p2611_p2 = pnand %p2610_p1, %p2606_p12 }
 0xb62   : > { %2614 = shalt.err (!%p2611_p2)
}
 0xb63   : > { %s2691_s18 = smov 128   ;;  %s2692_s17 = smov 256  }
 0xb64   : > { %s2693_s19 = smov 8  }
 0xb65   : > { %2408 = dma.vmem_to_hbm [thread:$0]  (%p2820_p3), %s3264_s29, 256, %s3262_s21, %s3270_s16, %s2691_s18, %s2692_s17, %s2693_s19  }
 0xb66 PF: > { %s3363_s24 = sld [smem:[#allocation10_spill]] }
 0xb67   : > { %s3364_s20 = sld [smem:[#allocation6_spill]] }
 0xb6c   : > { %p2414_p4 = scmp.ge.s32.totalorder %s3363_s24, 2 }
 0xb6d   : > { %s2007_s23 = sand.u32 1, %s3364_s20  }
 0xb6e   : > { %p2411_p5 = pnand %p2414_p4, %p2829_p8  ;;  %s2008_s26 = scalar_lea.sflag [#allocation4], %s2007_s23 }
 0xb70   : > { %p2412_p6 = pneg %p2411_p5 }
 0xb72   : > { %2648 = dma.done.wait (%p2412_p6), %s2008_s26, 256  }
 0xb73   : > { %2650 = vsyncadd (%p2412_p6), %s2008_s26, 4294967040  ;;  %s27_s20 = sadd.s32 1, %s3363_s24   ;;  %s3366_s14 = sld [smem:[#allocation7_spill]] }
 0xb74   : > { %p24_p7 = scmp.ge.s32.totalorder %s27_s20, 6   ;;  %s3367_s15 = sld [smem:[#allocation15_spill]] }
 0xb75   : > { %s3368_s16 = sld [smem:[#allocation8_spill]]  ;;  %s3372_s29 = smov %s2657_s30 }
 0xb76   : > { %s3369_s17 = sld [smem:[#allocation9_spill]]  ;;  %26 = sbr.rel (!%p24_p7) target bundleno = 7 (0x7), region = 135 }
 0xb77   : > { %s3370_s18 = sld [smem:[#allocation11_spill]] }
 0xb78   : > { %s3371_s19 = sld [smem:[#allocation13_spill]] }
 0xb79   : > { %s3373_s30 = smov %s3366_s14 }
 0xb7b   :  { %2013 = vsyncpa [#allocation4], 1 }
 0xb7c   :  { %2015 = vsyncpa [#allocation4 + $0x1], 1 }

</bundles_post_ra>
